<compile_context>
chip_gen: v6e
topology: v6e:2x2x1
jax: 0.10.0
libtpu: 0.0.40
codegen_flags: <defaults>
</compile_context>

<pallas_src>
import jax
import jax.numpy as jnp
from jax import lax
from jax.experimental import pallas as pl
from jax.experimental.pallas import tpu as pltpu


# ----------------------------------------------------------------------------
# Pallas kernel: global-average-pool + 4 fused Linear+ReLU layers, K-tiled
# ----------------------------------------------------------------------------
def head_kernel(feat_ref, w1_ref, b1_ref, w2_ref, b2_ref,
                w3_ref, b3_ref, w4_ref, b4_ref, out_ref, acc_ref):
    k = pl.program_id(0)

    @pl.when(k == 0)
    def _():
        acc_ref[...] = jnp.zeros_like(acc_ref)

    # AdaptiveAvgPool2d(1) on this channel slice: mean over spatial axis in f32
    # (keep elementwise math f32 for v5e), then bf16 x bf16 MXU matmul with f32
    # accumulation into the resident scratch.
    x_k = jnp.mean(feat_ref[...].astype(jnp.float32), axis=1)        # (B, tk) f32
    acc_ref[...] += jnp.dot(x_k.astype(jnp.bfloat16), w1_ref[...],
                            preferred_element_type=jnp.float32)      # (B, 1024)

    @pl.when(k == pl.num_programs(0) - 1)
    def _():
        h = jnp.maximum(acc_ref[...] + b1_ref[...], 0.0)             # (B, 1024) f32
        h = jnp.dot(h.astype(jnp.bfloat16), w2_ref[...],
                    preferred_element_type=jnp.float32) + b2_ref[...]
        h = jnp.maximum(h, 0.0)                                      # (B, 256)
        h = jnp.dot(h.astype(jnp.bfloat16), w3_ref[...],
                    preferred_element_type=jnp.float32) + b3_ref[...]
        h = jnp.maximum(h, 0.0)                                      # (B, 128) padded
        h = jnp.dot(h.astype(jnp.bfloat16), w4_ref[...],
                    preferred_element_type=jnp.float32) + b4_ref[...]
        out_ref[...] = h.astype(out_ref.dtype)                       # (B, 128) padded


def classifier_head(feat_bsc, head_params, *, tk=512):
    """feat_bsc: (B, S, 2048) bf16 -> logits (B, 4) float32."""
    feat_bsc = feat_bsc.astype(jnp.bfloat16)
    B, S, C = feat_bsc.shape
    assert C % tk == 0
    w1, b1, w2, b2, w3, b3, w4, b4 = head_params

    # Zero-pad the tiny tail layers to lane width 128 so the last GEMMs and the
    # output store are lane-dense; real logits are sliced out below. Under jit
    # with constant params this padding is constant-folded.
    w3p = jnp.zeros((256, 128), w3.dtype).at[:, :64].set(w3)
    b3p = jnp.zeros((1, 128), b3.dtype).at[:, :64].set(b3)
    w4p = jnp.zeros((128, 128), w4.dtype).at[:64, :4].set(w4)
    b4p = jnp.zeros((1, 128), b4.dtype).at[:, :4].set(b4)

    grid = (C // tk,)
    in_specs = [
        pl.BlockSpec((B, S, tk), lambda k: (0, 0, k)),   # features: streamed over K
        pl.BlockSpec((tk, 1024), lambda k: (k, 0)),      # w1: streamed over K
        pl.BlockSpec((1, 1024), lambda k: (0, 0)),       # b1 (resident)
        pl.BlockSpec((1024, 256), lambda k: (0, 0)),     # w2 (resident)
        pl.BlockSpec((1, 256), lambda k: (0, 0)),        # b2
        pl.BlockSpec((256, 128), lambda k: (0, 0)),      # w3 padded
        pl.BlockSpec((1, 128), lambda k: (0, 0)),        # b3 padded
        pl.BlockSpec((128, 128), lambda k: (0, 0)),      # w4 padded
        pl.BlockSpec((1, 128), lambda k: (0, 0)),        # b4 padded
    ]

    out_padded = pl.pallas_call(
        head_kernel,
        out_shape=jax.ShapeDtypeStruct((B, 128), jnp.float32),
        grid_spec=pltpu.PrefetchScalarGridSpec(
            num_scalar_prefetch=0,
            grid=grid,
            in_specs=in_specs,
            out_specs=pl.BlockSpec((B, 128), lambda k: (0, 0)),
            scratch_shapes=[pltpu.VMEM((B, 1024), jnp.float32)],
        ),
        compiler_params=pltpu.CompilerParams(
            dimension_semantics=("arbitrary",)),
    )(feat_bsc, w1, b1, w2, b2, w3p, b3p, w4p, b4p)

    return out_padded[:, :4]


# ----------------------------------------------------------------------------
# Plain-JAX ResNet50 backbone (inference-mode BN), deterministic synthetic params
# ----------------------------------------------------------------------------
class KeyGen:
    def __init__(self, seed=0):
        self.key = jax.random.PRNGKey(seed)

    def __call__(self):
        self.key, sub = jax.random.split(self.key)
        return sub


def conv2d(x, w, stride=1, padding=0):
    return lax.conv_general_dilated(
        x, w, window_strides=(stride, stride),
        padding=[(padding, padding), (padding, padding)],
        dimension_numbers=("NCHW", "OIHW", "NCHW"))


def batchnorm(x, p, eps=1e-5):
    gamma, beta, mean, var = p
    inv = gamma / jnp.sqrt(var + eps)
    return x * inv[None, :, None, None] + (beta - mean * inv)[None, :, None, None]


def maxpool3x3s2(x):
    return lax.reduce_window(
        x, -jnp.inf, lax.max,
        window_dimensions=(1, 1, 3, 3), window_strides=(1, 1, 2, 2),
        padding=[(0, 0), (0, 0), (1, 1), (1, 1)])


def conv_w(kg, out_c, in_c, k):
    fan_in = in_c * k * k
    return jax.random.normal(kg(), (out_c, in_c, k, k), jnp.float32) * jnp.sqrt(2.0 / fan_in)


def bn_p(c):
    return (jnp.ones((c,), jnp.float32), jnp.zeros((c,), jnp.float32),
            jnp.zeros((c,), jnp.float32), jnp.ones((c,), jnp.float32))


def make_bottleneck(kg, in_c, planes, stride):
    p = {
        "conv1": conv_w(kg, planes, in_c, 1), "bn1": bn_p(planes),
        "conv2": conv_w(kg, planes, planes, 3), "bn2": bn_p(planes),
        "conv3": conv_w(kg, planes * 4, planes, 1), "bn3": bn_p(planes * 4),
    }
    if stride != 1 or in_c != planes * 4:
        p["down_conv"] = conv_w(kg, planes * 4, in_c, 1)
        p["down_bn"] = bn_p(planes * 4)
    return p


def bottleneck_fwd(x, p, stride):
    identity = x
    out = jax.nn.relu(batchnorm(conv2d(x, p["conv1"]), p["bn1"]))
    out = jax.nn.relu(batchnorm(conv2d(out, p["conv2"], stride=stride, padding=1), p["bn2"]))
    out = batchnorm(conv2d(out, p["conv3"]), p["bn3"])
    if "down_conv" in p:
        identity = batchnorm(conv2d(x, p["down_conv"], stride=stride), p["down_bn"])
    return jax.nn.relu(out + identity)


def make_resnet50(kg):
    params = {"conv1": conv_w(kg, 64, 3, 7), "bn1": bn_p(64), "layers": []}
    in_c = 64
    for planes, blocks, stride in [(64, 3, 1), (128, 4, 2), (256, 6, 2), (512, 3, 2)]:
        layer = []
        for i in range(blocks):
            s = stride if i == 0 else 1
            layer.append((make_bottleneck(kg, in_c, planes, s), s))
            in_c = planes * 4
        params["layers"].append(layer)
    return params


def resnet50_features(x, params):
    x = jax.nn.relu(batchnorm(conv2d(x, params["conv1"], stride=2, padding=3), params["bn1"]))
    x = maxpool3x3s2(x)
    for layer in params["layers"]:
        for bp, s in layer:
            x = bottleneck_fwd(x, bp, s)
    return x  # (B, 2048, H/32, W/32)


def make_head(kg):
    """Linear weights stored as (in, out) in bf16 (y = x @ W + b == PyTorch
    x @ W_pt.T + b); biases kept in f32 for f32 elementwise math in the kernel."""
    def linear(in_f, out_f):
        bound = 1.0 / jnp.sqrt(in_f)
        w = jax.random.uniform(kg(), (in_f, out_f), jnp.float32, -bound, bound)
        b = jax.random.uniform(kg(), (1, out_f), jnp.float32, -bound, bound)
        return w.astype(jnp.bfloat16), b
    w1, b1 = linear(2048, 1024)
    w2, b2 = linear(1024, 256)
    w3, b3 = linear(256, 64)
    w4, b4 = linear(64, 4)
    return (w1, b1, w2, b2, w3, b3, w4, b4)


# ----------------------------------------------------------------------------
# Full Classifies_model forward
# ----------------------------------------------------------------------------
def classifies_model_forward(x, backbone_params, head_params):
    feat = resnet50_features(x, backbone_params)                 # (B, 2048, h, w) NCHW
    B, C, H, W = feat.shape
    feat_bsc = jnp.transpose(feat, (0, 2, 3, 1)).reshape(B, H * W, C)
    feat_bsc = feat_bsc.astype(jnp.bfloat16)                     # halve the feature DMA
    return classifier_head(feat_bsc, head_params)                # (B, 4)


if __name__ == "__main__":
    kg = KeyGen(seed=0)
    backbone_params = make_resnet50(kg)
    head_params = make_head(kg)

    x = jax.random.normal(jax.random.PRNGKey(0), (2, 3, 64, 64), jnp.float32)

    fwd = jax.jit(lambda inp: classifies_model_forward(inp, backbone_params, head_params))
    out = fwd(x)
    jax.block_until_ready(out)

    assert out.shape == (2, 4) and out.dtype == jnp.float32
    print("KERNEL_OK")
</pallas_src>

<mosaic_0001>
module attributes {stable_mosaic.version = 11 : i64} {
  func.func @head_kernel(%arg0: i32, %arg1: memref<2x4x512xbf16, #tpu.memory_space<vmem>>, %arg2: memref<512x1024xbf16, #tpu.memory_space<vmem>>, %arg3: memref<1x1024xf32, #tpu.memory_space<vmem>>, %arg4: memref<1024x256xbf16, #tpu.memory_space<vmem>>, %arg5: memref<1x256xf32, #tpu.memory_space<vmem>>, %arg6: memref<256x128xbf16, #tpu.memory_space<vmem>>, %arg7: memref<1x128xf32, #tpu.memory_space<vmem>>, %arg8: memref<128x128xbf16, #tpu.memory_space<vmem>>, %arg9: memref<1x128xf32, #tpu.memory_space<vmem>>, %arg10: memref<2x128xf32, #tpu.memory_space<vmem>>, %arg11: memref<2x1024xf32, #tpu.memory_space<vmem>>) attributes {dimension_semantics = [#tpu.dimension_semantics<arbitrary>], iteration_bounds = array<i64: 4>, scalar_prefetch = 0 : i64, scratch_operands = 1 : i64, tpu.core_type = #tpu.core_type<tc>, window_params = [{transform_indices = @transform_0, window_bounds = array<i64: 2, 4, 512>}, {transform_indices = @transform_1, window_bounds = array<i64: 512, 1024>}, {pipeline_mode = #tpu.pipeline_mode<synchronous>, transform_indices = @transform_2, window_bounds = array<i64: 1, 1024>}, {pipeline_mode = #tpu.pipeline_mode<synchronous>, transform_indices = @transform_3, window_bounds = array<i64: 1024, 256>}, {pipeline_mode = #tpu.pipeline_mode<synchronous>, transform_indices = @transform_4, window_bounds = array<i64: 1, 256>}, {pipeline_mode = #tpu.pipeline_mode<synchronous>, transform_indices = @transform_5, window_bounds = array<i64: 256, 128>}, {pipeline_mode = #tpu.pipeline_mode<synchronous>, transform_indices = @transform_6, window_bounds = array<i64: 1, 128>}, {pipeline_mode = #tpu.pipeline_mode<synchronous>, transform_indices = @transform_7, window_bounds = array<i64: 128, 128>}, {pipeline_mode = #tpu.pipeline_mode<synchronous>, transform_indices = @transform_8, window_bounds = array<i64: 1, 128>}, {pipeline_mode = #tpu.pipeline_mode<synchronous>, transform_indices = @transform_9, window_bounds = array<i64: 2, 128>}]} {
    %c0_i32 = arith.constant 0 : i32
    %0 = arith.cmpi eq, %arg0, %c0_i32 : i32
    %1 = arith.extui %0 : i1 to i32
    %c0_i32_0 = arith.constant 0 : i32
    %2 = arith.cmpi ne, %1, %c0_i32_0 : i32
    scf.if %2 {
      %cst_12 = arith.constant 0.000000e+00 : f32
      %17 = vector.broadcast %cst_12 : f32 to vector<2x1024xf32>
      %c0_13 = arith.constant 0 : index
      %c0_14 = arith.constant 0 : index
      %18 = vector.load %arg11[%c0_13, %c0_14] : memref<2x1024xf32, #tpu.memory_space<vmem>>, vector<2x1024xf32>
      tpu.vector_store %arg11[%c0_13, %c0_14], %17 {strides = array<i32>} : memref<2x1024xf32, #tpu.memory_space<vmem>>, vector<2x1024xf32>,
    } else {
    }
    %c0 = arith.constant 0 : index
    %c0_1 = arith.constant 0 : index
    %c0_2 = arith.constant 0 : index
    %3 = vector.load %arg1[%c0, %c0_1, %c0_2] : memref<2x4x512xbf16, #tpu.memory_space<vmem>>, vector<2x4x512xbf16>
    %4 = arith.extf %3 : vector<2x4x512xbf16> to vector<2x4x512xf32>
    %cst = arith.constant dense<0.000000e+00> : vector<2x512xf32>
    %5 = vector.multi_reduction <add>, %4, %cst [1] : vector<2x4x512xf32> to vector<2x512xf32>
    %cst_3 = arith.constant 4.000000e+00 : f32
    %6 = vector.broadcast %cst_3 : f32 to vector<2x512xf32>
    %7 = arith.divf %5, %6 : vector<2x512xf32>
    %c0_4 = arith.constant 0 : index
    %c0_5 = arith.constant 0 : index
    %8 = vector.load %arg11[%c0_4, %c0_5] : memref<2x1024xf32, #tpu.memory_space<vmem>>, vector<2x1024xf32>
    %9 = arith.truncf %7 : vector<2x512xf32> to vector<2x512xbf16>
    %c0_6 = arith.constant 0 : index
    %c0_7 = arith.constant 0 : index
    %10 = vector.load %arg2[%c0_6, %c0_7] : memref<512x1024xbf16, #tpu.memory_space<vmem>>, vector<512x1024xbf16>
    %cst_8 = arith.constant dense<0.000000e+00> : vector<2x1024xf32>
    %11 = tpu.matmul %9, %10, %cst_8 {dimension_numbers = #tpu.dot_dimension_numbers<[1], [0], [0], [1], [0, 0, 1, 1], [], []>} : vector<2x512xbf16>, vector<512x1024xbf16>, vector<2x1024xf32> -> vector<2x1024xf32>
    %12 = arith.addf %8, %11 : vector<2x1024xf32>
    %c0_9 = arith.constant 0 : index
    %c0_10 = arith.constant 0 : index
    %13 = vector.load %arg11[%c0_9, %c0_10] : memref<2x1024xf32, #tpu.memory_space<vmem>>, vector<2x1024xf32>
    tpu.vector_store %arg11[%c0_9, %c0_10], %12 {strides = array<i32>} : memref<2x1024xf32, #tpu.memory_space<vmem>>, vector<2x1024xf32>,
    %c3_i32 = arith.constant 3 : i32
    %14 = arith.cmpi eq, %arg0, %c3_i32 : i32
    %15 = arith.extui %14 : i1 to i32
    %c0_i32_11 = arith.constant 0 : i32
    %16 = arith.cmpi ne, %15, %c0_i32_11 : i32
    scf.if %16 {
      %c0_12 = arith.constant 0 : index
      %c0_13 = arith.constant 0 : index
      %17 = vector.load %arg11[%c0_12, %c0_13] : memref<2x1024xf32, #tpu.memory_space<vmem>>, vector<2x1024xf32>
      %c0_14 = arith.constant 0 : index
      %c0_15 = arith.constant 0 : index
      %18 = vector.load %arg3[%c0_14, %c0_15] : memref<1x1024xf32, #tpu.memory_space<vmem>>, vector<1x1024xf32>
      %19 = vector.broadcast %18 : vector<1x1024xf32> to vector<2x1024xf32>
      %20 = arith.addf %17, %19 : vector<2x1024xf32>
      %cst_16 = arith.constant 0.000000e+00 : f32
      %21 = vector.broadcast %cst_16 : f32 to vector<2x1024xf32>
      %22 = arith.maximumf %20, %21 : vector<2x1024xf32>
      %23 = arith.truncf %22 : vector<2x1024xf32> to vector<2x1024xbf16>
      %c0_17 = arith.constant 0 : index
      %c0_18 = arith.constant 0 : index
      %24 = vector.load %arg4[%c0_17, %c0_18] : memref<1024x256xbf16, #tpu.memory_space<vmem>>, vector<1024x256xbf16>
      %cst_19 = arith.constant dense<0.000000e+00> : vector<2x256xf32>
      %25 = tpu.matmul %23, %24, %cst_19 {dimension_numbers = #tpu.dot_dimension_numbers<[1], [0], [0], [1], [0, 0, 1, 1], [], []>} : vector<2x1024xbf16>, vector<1024x256xbf16>, vector<2x256xf32> -> vector<2x256xf32>
      %c0_20 = arith.constant 0 : index
      %c0_21 = arith.constant 0 : index
      %26 = vector.load %arg5[%c0_20, %c0_21] : memref<1x256xf32, #tpu.memory_space<vmem>>, vector<1x256xf32>
      %27 = vector.broadcast %26 : vector<1x256xf32> to vector<2x256xf32>
      %28 = arith.addf %25, %27 : vector<2x256xf32>
      %cst_22 = arith.constant 0.000000e+00 : f32
      %29 = vector.broadcast %cst_22 : f32 to vector<2x256xf32>
      %30 = arith.maximumf %28, %29 : vector<2x256xf32>
      %31 = arith.truncf %30 : vector<2x256xf32> to vector<2x256xbf16>
      %c0_23 = arith.constant 0 : index
      %c0_24 = arith.constant 0 : index
      %32 = vector.load %arg6[%c0_23, %c0_24] : memref<256x128xbf16, #tpu.memory_space<vmem>>, vector<256x128xbf16>
      %cst_25 = arith.constant dense<0.000000e+00> : vector<2x128xf32>
      %33 = tpu.matmul %31, %32, %cst_25 {dimension_numbers = #tpu.dot_dimension_numbers<[1], [0], [0], [1], [0, 0, 1, 1], [], []>} : vector<2x256xbf16>, vector<256x128xbf16>, vector<2x128xf32> -> vector<2x128xf32>
      %c0_26 = arith.constant 0 : index
      %c0_27 = arith.constant 0 : index
      %34 = vector.load %arg7[%c0_26, %c0_27] : memref<1x128xf32, #tpu.memory_space<vmem>>, vector<1x128xf32>
      %35 = vector.broadcast %34 : vector<1x128xf32> to vector<2x128xf32>
      %36 = arith.addf %33, %35 : vector<2x128xf32>
      %cst_28 = arith.constant 0.000000e+00 : f32
      %37 = vector.broadcast %cst_28 : f32 to vector<2x128xf32>
      %38 = arith.maximumf %36, %37 : vector<2x128xf32>
      %39 = arith.truncf %38 : vector<2x128xf32> to vector<2x128xbf16>
      %c0_29 = arith.constant 0 : index
      %c0_30 = arith.constant 0 : index
      %40 = vector.load %arg8[%c0_29, %c0_30] : memref<128x128xbf16, #tpu.memory_space<vmem>>, vector<128x128xbf16>
      %cst_31 = arith.constant dense<0.000000e+00> : vector<2x128xf32>
      %41 = tpu.matmul %39, %40, %cst_31 {dimension_numbers = #tpu.dot_dimension_numbers<[1], [0], [0], [1], [0, 0, 1, 1], [], []>} : vector<2x128xbf16>, vector<128x128xbf16>, vector<2x128xf32> -> vector<2x128xf32>
      %c0_32 = arith.constant 0 : index
      %c0_33 = arith.constant 0 : index
      %42 = vector.load %arg9[%c0_32, %c0_33] : memref<1x128xf32, #tpu.memory_space<vmem>>, vector<1x128xf32>
      %43 = vector.broadcast %42 : vector<1x128xf32> to vector<2x128xf32>
      %44 = arith.addf %41, %43 : vector<2x128xf32>
      %c0_34 = arith.constant 0 : index
      %c0_35 = arith.constant 0 : index
      %45 = vector.load %arg10[%c0_34, %c0_35] : memref<2x128xf32, #tpu.memory_space<vmem>>, vector<2x128xf32>
      tpu.vector_store %arg10[%c0_34, %c0_35], %44 {strides = array<i32>} : memref<2x128xf32, #tpu.memory_space<vmem>>, vector<2x128xf32>,
    } else {
    }
    return
  }
  func.func @transform_0(%arg0: i32) -> (i32, i32, i32) {
    %c0_i32 = arith.constant 0 : i32
    %c0_i32_0 = arith.constant 0 : i32
    %c0_i32_1 = arith.constant 0 : i32
    return %c0_i32, %c0_i32_0, %arg0 : i32, i32, i32
  }
  func.func @transform_1(%arg0: i32) -> (i32, i32) {
    %c0_i32 = arith.constant 0 : i32
    %c0_i32_0 = arith.constant 0 : i32
    return %arg0, %c0_i32 : i32, i32
  }
  func.func @transform_2(%arg0: i32) -> (i32, i32) {
    %c0_i32 = arith.constant 0 : i32
    %c0_i32_0 = arith.constant 0 : i32
    %c0_i32_1 = arith.constant 0 : i32
    return %c0_i32, %c0_i32_0 : i32, i32
  }
  func.func @transform_3(%arg0: i32) -> (i32, i32) {
    %c0_i32 = arith.constant 0 : i32
    %c0_i32_0 = arith.constant 0 : i32
    %c0_i32_1 = arith.constant 0 : i32
    return %c0_i32, %c0_i32_0 : i32, i32
  }
  func.func @transform_4(%arg0: i32) -> (i32, i32) {
    %c0_i32 = arith.constant 0 : i32
    %c0_i32_0 = arith.constant 0 : i32
    %c0_i32_1 = arith.constant 0 : i32
    return %c0_i32, %c0_i32_0 : i32, i32
  }
  func.func @transform_5(%arg0: i32) -> (i32, i32) {
    %c0_i32 = arith.constant 0 : i32
    %c0_i32_0 = arith.constant 0 : i32
    %c0_i32_1 = arith.constant 0 : i32
    return %c0_i32, %c0_i32_0 : i32, i32
  }
  func.func @transform_6(%arg0: i32) -> (i32, i32) {
    %c0_i32 = arith.constant 0 : i32
    %c0_i32_0 = arith.constant 0 : i32
    %c0_i32_1 = arith.constant 0 : i32
    return %c0_i32, %c0_i32_0 : i32, i32
  }
  func.func @transform_7(%arg0: i32) -> (i32, i32) {
    %c0_i32 = arith.constant 0 : i32
    %c0_i32_0 = arith.constant 0 : i32
    %c0_i32_1 = arith.constant 0 : i32
    return %c0_i32, %c0_i32_0 : i32, i32
  }
  func.func @transform_8(%arg0: i32) -> (i32, i32) {
    %c0_i32 = arith.constant 0 : i32
    %c0_i32_0 = arith.constant 0 : i32
    %c0_i32_1 = arith.constant 0 : i32
    return %c0_i32, %c0_i32_0 : i32, i32
  }
  func.func @transform_9(%arg0: i32) -> (i32, i32) {
    %c0_i32 = arith.constant 0 : i32
    %c0_i32_0 = arith.constant 0 : i32
    %c0_i32_1 = arith.constant 0 : i32
    return %c0_i32, %c0_i32_0 : i32, i32
  }
}

</mosaic_0001>

<bundles_post_ra>
// kernel: _lambda_.1
= control target key start
LH: loop header
LB: loop body
LE: loop exit
PB: predicated region body
PF: predicated region fallthrough
CT: control target
= control target key end

     0   :  { %14 = vsyncpa [#allocation5], 0  ;;  %s4698_s30 = smov 0   ;;  %s4700_s10 = smov 0   ;;  %s5663_s0 = inlined_call_operand.vmem [shape: bf16[2,4,2048], index: 0, kind: input, shape index: {}]   ;;  %s5664_s1 = inlined_call_operand.vmem [shape: bf16[2048,1024], index: 1, kind: input, shape index: {}]   ;;  %s5665_s2 = inlined_call_operand.vmem [shape: f32[1,1024], index: 2, kind: input, shape index: {}]   ;;  %s5666_s3 = inlined_call_operand.vmem [shape: bf16[1024,256], index: 3, kind: input, shape index: {}]   ;;  %s5667_s4 = inlined_call_operand.vmem [shape: f32[1,256], index: 4, kind: input, shape index: {}]   ;;  %s5668_s5 = inlined_call_operand.vmem [shape: bf16[256,128], index: 5, kind: input, shape index: {}]   ;;  %s5669_s6 = inlined_call_operand.vmem [shape: f32[1,128], index: 6, kind: input, shape index: {}]   ;;  %s5670_s7 = inlined_call_operand.vmem [shape: bf16[128,128], index: 7, kind: input, shape index: {}]   ;;  %s5671_s8 = inlined_call_operand.vmem [shape: f32[1,128], index: 8, kind: input, shape index: {}]   ;;  %s5672_s9 = inlined_call_operand.hbm [shape: f32[2,128], index: 9, kind: output, shape index: {}]  }
   0x1   :  { %s4702_s11 = smov 0  }
   0x2 LB: > { %s4711_s12 = sadd.s32 4294967295, %s4641_s11   ;;  %s4713_s13 = sadd.s32 1, %s4641_s11   ;;  %s4641_s11 = sphi %s4702_s11, %s5675_s11   ;;  %s4637_s10 = sphi %s4700_s10, %s5674_s10   ;;  %s4633_s30 = sphi %s4698_s30, %s5673_s30  }
   0x3   : > { %s24_s14 = ssub.s32 %s4641_s11, %s4713_s13  ;;  %s27_s15 = sadd.s32 1, %s4637_s10 }
   0x4   : > { %p25_p0 = scmp.eq.s32.totalorder %s24_s14, 0  ;;  %p34_p1 = scmp.ne.s32.totalorder %s4637_s10, %s4633_s30 }
   0x5   : > { %p35_p2 = scmp.eq.s32.totalorder %s4641_s11, 0  ;;  %p3862_p4 = scmp.ge.s32.totalorder %s4641_s11, 4 }
   0x6   : > { %s4720_s16 = scalar_select %p25_p0, %s4637_s10, %s27_s15  }
   0x7   : > { %p36_p3 = por %p35_p2, %p34_p1  ;;  %275 = sbr.rel (%p3862_p4) target bundleno = 18 (0x12), region = 44 }
   0xc   : > { %278 = sbr.rel (!%p36_p3) target bundleno = 18 (0x12), region = 48  ;;  %s280_s17 = sand.u32 (%p36_p3), 1, %s4637_s10  }
   0xd   : > { %s4287_s18 = sshll.u32 (%p36_p3), %s4641_s11, 3  ;;  %s3863_s19 = sshll.u32 (%p36_p3), %s280_s17, 4 }
   0xe   : > { %s285_s22 = scalar_lea.vmem (%p36_p3), %s5663_s0, %s4287_s18  ;;  %s282_s23 = scalar_lea.vmem (%p36_p3), [#allocation3], %s3863_s19 }
   0xf   : > { %v316_v0 = vld [vmem:[%s285_s22] sm:$0xff] (%p36_p3) }
  0x10   : > { %v318_v1 = vld [vmem:[%s285_s22 + $0x20] sm:$0xff] (%p36_p3)  ;;  %317 = vst [vmem:[%s282_s23] sm:$0xff] (%p36_p3), %v316_v0 }
  0x11   : > { %319 = vst [vmem:[%s282_s23 + $0x8] sm:$0xff] %v318_v1 }
  0x12 PF: > { %p3866_p5 = scmp.ge.s32.totalorder %s4641_s11, 1  ;;  %p334_p6 = scmp.lt.s32.totalorder %s4641_s11, 5 }
  0x14   : > { %p335_p7 = pnand %p3866_p5, %p334_p6 }
  0x15   : > { %s341_s24 = sand.u32 (!%p335_p7), 1, %s4633_s30   ;;  %s3868_s25 = sshll.u32 (!%p335_p7), %s4711_s12, 6 }
  0x16   : > { %338 = sbr.rel (%p335_p7) target bundleno = 1254 (0x4e6), region = 90  ;;  %s4728_s26 = sshll.u32 (!%p335_p7), %s341_s24, 4 }
  0x17   : > { %p379_p8 = scmp.lt.s32.totalorder (!%p335_p7), %s3868_s25, 255  ;;  %s343_s15 = scalar_lea.vmem (!%p335_p7), [#allocation3], %s4728_s26 }
  0x18   : > { %p3871_p9 = scmp.ne.s32.totalorder (!%p335_p7), %s4711_s12, 0 }
  0x1b   : > { %s5677_s25 = smov (!%p379_p8, %s3868_s25), 255  ;;  %389 = sbr.rel (%p3871_p9) target bundleno = 34 (0x22), region = 98 }
  0x1c   : > { %s4288_s27 = sshll.u32 %s5677_s25, 5 }
  0x1d   : > { %s4733_s14 = scalar_lea.vmem %s5664_s1, %s4288_s27 }
  0x20   : > { %v4643_v2 = vmov 0.0  }
  0x21   : > { %390 = vst [vmem:[#allocation2] sm:$0xff] %v4643_v2  ;;  %391 = vst [vmem:[#allocation2 + $0x8] sm:$0xff] %v4643_v2 }
  0x22 PF: > { %v542_v3 = vld [vmem:[%s4733_s14 + $0x1c0] sm:$0xff]  ;;  %vm410_vm0 = vcmask 1043456   ;;  %vm758_vm1 = vcmask 1041409   ;;  %p4128_p10 = scmp.ne.s32.totalorder %s4711_s12, 3 }
  0x23   : > { %v546_v4 = vld [vmem:[%s4733_s14 + $0x1e0] sm:$0xff] }
  0x24   : > { %v670_v5 = vld [vmem:[%s4733_s14 + $0x5c0] sm:$0xff]  ;;  %v3929_v6 = vcombine.high %v542_v3, %v546_v4  ;;  %v3928_v8 = vcombine.low %v542_v3, %v546_v4 }
  0x25   : > { %v674_v7 = vld [vmem:[%s4733_s14 + $0x5e0] sm:$0xff] }
  0x26   : > { %v534_v9 = vld [vmem:[%s4733_s14 + $0x180] sm:$0xff]  ;;  %v4057_v11 = vcombine.high %v670_v5, %v674_v7  ;;  %v4056_v12 = vcombine.low %v670_v5, %v674_v7  ;;  %2051 = vmatprep.subr.bf16.mxu0 %v3929_v6 }
  0x27   : > { %v538_v10 = vld [vmem:[%s4733_s14 + $0x1a0] sm:$0xff]  ;;  %2052 = vmatpush1.bf16.msra.mxu0 %v3928_v8  ;;  %v393_v8 = vld [vmem:[%s343_s15 + $0x8] sm:$0xff] }
  0x28   : > { %v3921_v13 = vcombine.high %v534_v9, %v538_v10  ;;  %v662_v14 = vld [vmem:[%s4733_s14 + $0x580] sm:$0xff]  ;;  %2092 = vmatprep.subr.bf16.mxu1 %v4057_v11  ;;  %v3920_v21 = vcombine.low %v534_v9, %v538_v10 }
  0x29   : > { %v666_v15 = vld [vmem:[%s4733_s14 + $0x5a0] sm:$0xff]  ;;  %2093 = vmatpush1.bf16.msra.mxu1 %v4056_v12  ;;  %v396_v12 = vunpack.c.l.bf16 %v393_v8 }
  0x2a   : > { %v526_v16 = vld [vmem:[%s4733_s14 + $0x140] sm:$0xff]  ;;  %v4049_v17 = vcombine.high %v662_v14, %v666_v15  ;;  %2053 = vmatprep.subr.bf16.mxu0 %v3921_v13  ;;  %v4048_v22 = vcombine.low %v662_v14, %v666_v15 }
  0x2b   : > { %v530_v18 = vld [vmem:[%s4733_s14 + $0x160] sm:$0xff]  ;;  %2054 = vmatpush1.bf16.msra.mxu0 %v3920_v21 }
  0x2c   : > { %v654_v19 = vld [vmem:[%s4733_s14 + $0x540] sm:$0xff]  ;;  %v3913_v23 = vcombine.high %v526_v16, %v530_v18  ;;  %2094 = vmatprep.subr.bf16.mxu1 %v4049_v17  ;;  %v3912_v29 = vcombine.low %v526_v16, %v530_v18  ;;  %v397_v16 = vunpack.c.h.bf16 %v393_v8  ;;  %v404_v18 = vcombine.high %v396_v12, %v396_v12 }
  0x2d   : > { %v658_v20 = vld [vmem:[%s4733_s14 + $0x560] sm:$0xff]  ;;  %2095 = vmatpush1.bf16.msra.mxu1 %v4048_v22 }
  0x2e   : > { %v4041_v24 = vcombine.high %v654_v19, %v658_v20  ;;  %v518_v25 = vld [vmem:[%s4733_s14 + $0x100] sm:$0xff]  ;;  %2055 = vmatprep.subr.bf16.mxu0 %v3913_v23  ;;  %v4040_v30 = vcombine.low %v654_v19, %v658_v20  ;;  %v439_v20 = vsel %vm410_vm0, %v396_v12, 0.0  ;;  %v405_v22 = vcombine.high %v397_v16, %v397_v16 }
  0x2f   : > { %v522_v26 = vld [vmem:[%s4733_s14 + $0x120] sm:$0xff]  ;;  %2056 = vmatpush1.bf16.msra.mxu0 %v3912_v29 }
  0x30   : > { %v646_v27 = vld [vmem:[%s4733_s14 + $0x500] sm:$0xff]  ;;  %v3905_v31 = vcombine.high %v518_v25, %v522_v26  ;;  %2096 = vmatprep.subr.bf16.mxu1 %v4041_v24  ;;  %v3904_v37 = vcombine.low %v518_v25, %v522_v26  ;;  %v440_v24 = vrot.slane %v439_v20, 4  ;;  %v446_v26 = vsel %vm410_vm0, %v404_v18, 0.0 }
  0x31   : > { %v650_v28 = vld [vmem:[%s4733_s14 + $0x520] sm:$0xff]  ;;  %2097 = vmatpush1.bf16.msra.mxu1 %v4040_v30 }
  0x32   : > { %v4033_v32 = vcombine.high %v646_v27, %v650_v28  ;;  %v510_v33 = vld [vmem:[%s4733_s14 + $0xc0] sm:$0xff]  ;;  %2057 = vmatprep.subr.bf16.mxu0 %v3905_v31  ;;  %v4032_v38 = vcombine.low %v646_v27, %v650_v28  ;;  %v453_v28 = vsel %vm410_vm0, %v397_v16, 0.0 }
  0x33   : > { %v514_v34 = vld [vmem:[%s4733_s14 + $0xe0] sm:$0xff]  ;;  %2058 = vmatpush1.bf16.msra.mxu0 %v3904_v37 }
  0x34   : > { %v638_v35 = vld [vmem:[%s4733_s14 + $0x4c0] sm:$0xff]  ;;  %v3897_v39 = vcombine.high %v510_v33, %v514_v34  ;;  %2098 = vmatprep.subr.bf16.mxu1 %v4033_v32  ;;  %v3896_v45 = vcombine.low %v510_v33, %v514_v34  ;;  %v447_v32 = vrot.slane %v446_v26, 4  ;;  %v460_v34 = vsel %vm410_vm0, %v405_v22, 0.0 }
  0x35   : > { %v642_v36 = vld [vmem:[%s4733_s14 + $0x4e0] sm:$0xff]  ;;  %2099 = vmatpush1.bf16.msra.mxu1 %v4032_v38  ;;  %v441_v38 = vadd.f32 %v440_v24, %v439_v20 }
  0x36   : > { %v4025_v40 = vcombine.high %v638_v35, %v642_v36  ;;  %v502_v41 = vld [vmem:[%s4733_s14 + $0x80] sm:$0xff]  ;;  %2059 = vmatprep.subr.bf16.mxu0 %v3897_v39  ;;  %v4024_v49 = vcombine.low %v638_v35, %v642_v36  ;;  %v461_v36 = vrot.slane %v460_v34, 4 }
  0x37   : > { %v506_v42 = vld [vmem:[%s4733_s14 + $0xa0] sm:$0xff]  ;;  %2060 = vmatpush1.bf16.msra.mxu0 %v3896_v45 }
  0x38   : > { %v630_v43 = vld [vmem:[%s4733_s14 + $0x480] sm:$0xff]  ;;  %v3889_v50 = vcombine.high %v502_v41, %v506_v42  ;;  %2100 = vmatprep.subr.bf16.mxu1 %v4025_v40  ;;  %v3888_v58 = vcombine.low %v502_v41, %v506_v42  ;;  %v448_v40 = vadd.f32 %v447_v32, %v446_v26  ;;  %v454_v42 = vrot.slane %v453_v28, 4 }
  0x39   : > { %v634_v44 = vld [vmem:[%s4733_s14 + $0x4a0] sm:$0xff]  ;;  %2101 = vmatpush1.bf16.msra.mxu1 %v4024_v49  ;;  %v462_v45 = vadd.f32 %v461_v36, %v460_v34 }
  0x3a   : > { %v4762_v46 = vld [vmem:[%s4733_s14 + $0x40] sm:$0xff]  ;;  %v4017_v54 = vcombine.high %v630_v43, %v634_v44  ;;  %v4016_v59 = vcombine.low %v630_v43, %v634_v44  ;;  %2061 = vmatprep.subr.bf16.mxu0 %v3889_v50  ;;  %v449_v50 = vrot.slane %v448_v40, 2 }
  0x3b   : > { %v4765_v47 = vld [vmem:[%s4733_s14 + $0x60] sm:$0xff]  ;;  %2062 = vmatpush1.bf16.msra.mxu0 %v3888_v58 }
  0x3c   : > { %v4768_v48 = vld [vmem:[%s4733_s14 + $0x440] sm:$0xff]  ;;  %v3881_v60 = vcombine.high %v4762_v46, %v4765_v47  ;;  %v3880_v1 = vcombine.low %v4762_v46, %v4765_v47  ;;  %2102 = vmatprep.subr.bf16.mxu1 %v4017_v54 }
  0x3d   : > { %v4771_v51 = vld [vmem:[%s4733_s14 + $0x460] sm:$0xff]  ;;  %2103 = vmatpush1.bf16.msra.mxu1 %v4016_v59 }
  0x3e   : > { %v4774_v52 = vld [vmem:[%s4733_s14] sm:$0xff]  ;;  %v4009_v0 = vcombine.high %v4768_v48, %v4771_v51  ;;  %v4008_v2 = vcombine.low %v4768_v48, %v4771_v51  ;;  %2063 = vmatprep.subr.bf16.mxu0 %v3881_v60  ;;  %v463_v60 = vrot.slane %v462_v45, 2 }
  0x3f   : > { %v4777_v53 = vld [vmem:[%s4733_s14 + $0x20] sm:$0xff]  ;;  %2064 = vmatpush1.bf16.msra.mxu0 %v3880_v1 }
  0x40   : > { %v4780_v55 = vld [vmem:[%s4733_s14 + $0x400] sm:$0xff]  ;;  %v3873_v3 = vcombine.high %v4774_v52, %v4777_v53  ;;  %v3872_v5 = vcombine.low %v4774_v52, %v4777_v53  ;;  %2104 = vmatprep.subr.bf16.mxu1 %v4009_v0  ;;  %v455_v52 = vadd.f32 %v454_v42, %v453_v28  ;;  %v442_v0 = vrot.slane %v441_v38, 2 }
  0x41   : > { %v4783_v56 = vld [vmem:[%s4733_s14 + $0x420] sm:$0xff]  ;;  %2105 = vmatpush1.bf16.msra.mxu1 %v4008_v2  ;;  %v450_v2 = vadd.f32 %v449_v50, %v448_v40 }
  0x42   : > { %v4786_v57 = vld [vmem:[%s4733_s14 + $0x3c0] sm:$0xff]  ;;  %v4001_v4 = vcombine.high %v4780_v55, %v4783_v56  ;;  %v4000_v6 = vcombine.low %v4780_v55, %v4783_v56  ;;  %2065 = vmatprep.subr.bf16.mxu0 %v3873_v3 }
  0x43   : > { %v4791_v61 = vld [vmem:[%s4733_s14 + $0x3e0] sm:$0xff]  ;;  %2066 = vmatpush1.bf16.msra.mxu0 %v3872_v5 }
  0x44   : > { %v4794_v62 = vld [vmem:[%s4733_s14 + $0x7c0] sm:$0xff]  ;;  %v3993_v9 = vcombine.high %v4786_v57, %v4791_v61  ;;  %v3992_v13 = vcombine.low %v4786_v57, %v4791_v61  ;;  %2106 = vmatprep.subr.bf16.mxu1 %v4001_v4  ;;  %v456_v4 = vrot.slane %v455_v52, 2 }
  0x45   : > { %v4797_v63 = vld [vmem:[%s4733_s14 + $0x7e0] sm:$0xff]  ;;  %2107 = vmatpush1.bf16.msra.mxu1 %v4000_v6 }
  0x46   : > { %v392_v7 = vld [vmem:[%s343_s15] sm:$0xff]  ;;  %v4121_v10 = vcombine.high %v4794_v62, %v4797_v63  ;;  %v4120_v14 = vcombine.low %v4794_v62, %v4797_v63  ;;  %2067 = vmatprep.subr.bf16.mxu0 %v3993_v9  ;;  %v451_v9 = vrot.slane %v450_v2, 1  ;;  %v457_v57 = vadd.f32 %v456_v4, %v455_v52 }
  0x47   : > { %v394_v11 = vunpack.c.l.bf16 %v392_v7  ;;  %v395_v15 = vunpack.c.h.bf16 %v392_v7  ;;  %v4832_v29 = vld [vmem:[%s4733_s14 + $0x380] sm:$0xff]  ;;  %2068 = vmatpush2.bf16.msra.mxu0 %v3992_v13 }
  0x48   : > { %v4835_v30 = vld [vmem:[%s4733_s14 + $0x3a0] sm:$0xff]  ;;  %2108 = vmatprep.subr.bf16.mxu1 %v4121_v10  ;;  %v452_v22 = vadd.f32 %v451_v9, %v450_v2 }
  0x49   : > { %v402_v17 = vcombine.high %v394_v11, %v394_v11  ;;  %v411_v19 = vsel %vm410_vm0, %v394_v11, 0.0  ;;  %v403_v21 = vcombine.high %v395_v15, %v395_v15  ;;  %v425_v27 = vsel %vm410_vm0, %v395_v15, 0.0  ;;  %v726_v47 = vld [vmem:[%s4733_s14 + $0x780] sm:$0xff]  ;;  %2109 = vmatpush2.bf16.msra.mxu1 %v4120_v14 }
  0x4a   : > { %v412_v23 = vrot.slane %v411_v19, 4  ;;  %v426_v41 = vrot.slane %v425_v27, 4  ;;  %v3985_v43 = vcombine.high %v4832_v29, %v4835_v30  ;;  %v730_v48 = vld [vmem:[%s4733_s14 + $0x7a0] sm:$0xff]  ;;  %v3984_v53 = vcombine.low %v4832_v29, %v4835_v30 }
  0x4b   : > { %v418_v25 = vsel %vm410_vm0, %v402_v17, 0.0  ;;  %v432_v33 = vsel %vm410_vm0, %v403_v21, 0.0  ;;  %v4846_v54 = vld [vmem:[%s4733_s14 + $0x340] sm:$0xff]  ;;  %v4113_v5 = vcombine.high %v726_v47, %v730_v48  ;;  %v4112_v7 = vcombine.low %v726_v47, %v730_v48 }
  0x4c   : > { %v419_v31 = vrot.slane %v418_v25, 4  ;;  %v433_v35 = vrot.slane %v432_v33, 4  ;;  %v413_v37 = vadd.f32 %v412_v23, %v411_v19  ;;  %v427_v51 = vadd.f32 %v426_v41, %v425_v27  ;;  %v4849_v58 = vld [vmem:[%s4733_s14 + $0x360] sm:$0xff]  ;;  %2069 = vmatprep.subr.bf16.mxu0 %v3985_v43 }
  0x4d   : > { %v464_v11 = vadd.f32 %v463_v60, %v462_v45  ;;  %v3977_v12 = vcombine.high %v4846_v54, %v4849_v58  ;;  %v718_v55 = vld [vmem:[%s4733_s14 + $0x740] sm:$0xff]  ;;  %v443_v19 = vadd.f32 %v442_v0, %v441_v38  ;;  %2110 = vmatprep.subr.bf16.mxu1 %v4113_v5  ;;  %v3976_v13 = vcombine.low %v4846_v54, %v4849_v58 }
  0x4e   : > { %v420_v39 = vadd.f32 %v419_v31, %v418_v25  ;;  %v434_v44 = vadd.f32 %v433_v35, %v432_v33  ;;  %v414_v46 = vrot.slane %v413_v37, 2  ;;  %v428_v3 = vrot.slane %v427_v51, 2  ;;  %v722_v56 = vld [vmem:[%s4733_s14 + $0x760] sm:$0xff]  ;;  %2070 = vmatpush2.bf16.msra.mxu0 %v3984_v53  ;;  %2111 = vmatpush2.bf16.msra.mxu1 %v4112_v7 }
  0x4f   : > { %v4865_v16 = vld [vmem:[%s4733_s14 + $0x300] sm:$0xff]  ;;  %v465_v18 = vrot.slane %v464_v11, 1  ;;  %v4105_v61 = vcombine.high %v718_v55, %v722_v56  ;;  %v4104_v25 = vcombine.low %v718_v55, %v722_v56  ;;  %v473_v27 = vmul.f32 0.25, %v452_v22  ;;  %2071 = vmatprep.subr.bf16.mxu0 %v3977_v12 }
  0x50   : > { %v421_v49 = vrot.slane %v420_v39, 2  ;;  %v435_v59 = vrot.slane %v434_v44, 2  ;;  %v415_v15 = vadd.f32 %v414_v46, %v413_v37  ;;  %v4868_v17 = vld [vmem:[%s4733_s14 + $0x320] sm:$0xff]  ;;  %v429_v20 = vadd.f32 %v428_v3, %v427_v51 }
  0x51   : > { %v466_v24 = vadd.f32 %v465_v18, %v464_v11  ;;  %v3969_v26 = vcombine.high %v4865_v16, %v4868_v17  ;;  %v710_v62 = vld [vmem:[%s4733_s14 + $0x700] sm:$0xff]  ;;  %v444_v33 = vrot.slane %v443_v19, 1  ;;  %v483_v35 = vpack.c.bf16 %v473_v27, %v473_v27  ;;  %2112 = vmatprep.subr.bf16.mxu1 %v4105_v61 }
  0x52   : > { %v422_v1 = vadd.f32 %v421_v49, %v420_v39  ;;  %v436_v8 = vadd.f32 %v435_v59, %v434_v44  ;;  %v714_v63 = vld [vmem:[%s4733_s14 + $0x720] sm:$0xff]  ;;  %v416_v32 = vrot.slane %v415_v15, 1  ;;  %v430_v36 = vrot.slane %v429_v20, 1  ;;  %2072 = vmatpush2.bf16.msra.mxu0 %v3976_v13  ;;  %2113 = vmatpush2.bf16.msra.mxu1 %v4104_v25 }
  0x53   : > { %v574_v28 = vld [vmem:[%s4733_s14 + $0x2c0] sm:$0xff]  ;;  %v475_v31 = vmul.f32 0.25, %v466_v24  ;;  %v458_v37 = vrot.slane %v457_v57, 1  ;;  %v4097_v38 = vcombine.high %v710_v62, %v714_v63  ;;  %v3968_v39 = vcombine.low %v4865_v16, %v4868_v17  ;;  %2073 = vmatprep.subr.bf16.mxu0 %v3969_v26 }
  0x54   : > { %v423_v6 = vrot.slane %v422_v1, 1  ;;  %v437_v10 = vrot.slane %v436_v8, 1  ;;  %v578_v29 = vld [vmem:[%s4733_s14 + $0x2e0] sm:$0xff]  ;;  %v4096_v42 = vcombine.low %v710_v62, %v714_v63  ;;  %v755_v47 = vunpack.c.l.b16 %v483_v35 }
  0x55   : > { %v485_v41 = vpack.c.bf16 %v475_v31, %v475_v31  ;;  %v3961_v43 = vcombine.high %v574_v28, %v578_v29  ;;  %v702_v44 = vld [vmem:[%s4733_s14 + $0x6c0] sm:$0xff]  ;;  %v417_v50 = vadd.f32 %v416_v32, %v415_v15  ;;  %v445_v51 = vadd.f32 %v444_v33, %v443_v19  ;;  %2114 = vmatprep.subr.bf16.mxu1 %v4097_v38  ;;  %v543_v31 = vld [vmem:[%s4733_s14 + $0x1c8] sm:$0xff] }
  0x56   : > { %v424_v21 = vadd.f32 %v423_v6, %v422_v1  ;;  %v438_v23 = vadd.f32 %v437_v10, %v436_v8  ;;  %v706_v45 = vld [vmem:[%s4733_s14 + $0x6e0] sm:$0xff]  ;;  %v431_v53 = vadd.f32 %v430_v36, %v429_v20  ;;  %v459_v54 = vadd.f32 %v458_v37, %v457_v57  ;;  %2074 = vmatpush2.bf16.msra.mxu0 %v3968_v39  ;;  %v547_v32 = vld [vmem:[%s4733_s14 + $0x1e8] sm:$0xff] }
  0x57   : > { %v757_v49 = vunpack.c.l.b16 %v485_v41  ;;  %v4089_v58 = vcombine.high %v702_v44, %v706_v45  ;;  %v566_v59 = vld [vmem:[%s4733_s14 + $0x280] sm:$0xff]  ;;  %v3960_v5 = vcombine.low %v574_v28, %v578_v29  ;;  %v468_v7 = vmul.f32 0.25, %v417_v50  ;;  %2115 = vmatpush2.bf16.msra.mxu1 %v4096_v42  ;;  %2075 = vmatprep.subr.bf16.mxu0 %v3961_v43  ;;  %v671_v33 = vld [vmem:[%s4733_s14 + $0x5c8] sm:$0xff] }
  0x58   : > { %v469_v14 = vmul.f32 0.25, %v424_v21  ;;  %v471_v30 = vmul.f32 0.25, %v438_v23  ;;  %v570_v60 = vld [vmem:[%s4733_s14 + $0x2a0] sm:$0xff]  ;;  %v472_v8 = vmul.f32 0.25, %v445_v51  ;;  %v4088_v11 = vcombine.low %v702_v44, %v706_v45  ;;  %v535_v41 = vld [vmem:[%s4733_s14 + $0x188] sm:$0xff] }
  0x59   : > { %v694_v2 = vld [vmem:[%s4733_s14 + $0x680] sm:$0xff]  ;;  %v3953_v12 = vcombine.high %v566_v59, %v570_v60  ;;  %v470_v55 = vmul.f32 0.25, %v431_v53  ;;  %v474_v56 = vmul.f32 0.25, %v459_v54  ;;  %2116 = vmatprep.subr.bf16.mxu1 %v4089_v58  ;;  %v3952_v10 = vcombine.low %v566_v59, %v570_v60  ;;  %v539_v42 = vld [vmem:[%s4733_s14 + $0x1a8] sm:$0xff] }
  0x5a   : > { %v479_v34 = vpack.c.bf16 %v469_v14, %v469_v14  ;;  %v481_v40 = vpack.c.bf16 %v471_v30, %v471_v30  ;;  %v698_v3 = vld [vmem:[%s4733_s14 + $0x6a0] sm:$0xff]  ;;  %2076 = vmatpush2.bf16.msra.mxu0 %v3960_v5  ;;  %v478_v19 = vpack.c.bf16 %v468_v7, %v468_v7  ;;  %v482_v20 = vpack.c.bf16 %v472_v8, %v472_v8  ;;  %v663_v44 = vld [vmem:[%s4733_s14 + $0x588] sm:$0xff] }
  0x5b   : > { %v4081_v6 = vcombine.high %v694_v2, %v698_v3  ;;  %v558_v9 = vld [vmem:[%s4733_s14 + $0x240] sm:$0xff]  ;;  %v4080_v18 = vcombine.low %v694_v2, %v698_v3  ;;  %2117 = vmatpush2.bf16.msra.mxu1 %v4088_v11  ;;  %2077 = vmatprep.subr.bf16.mxu0 %v3953_v12  ;;  %v480_v22 = vpack.c.bf16 %v470_v55, %v470_v55  ;;  %v667_v45 = vld [vmem:[%s4733_s14 + $0x5a8] sm:$0xff] }
  0x5c   : > { %v751_v46 = vunpack.c.l.b16 %v479_v34  ;;  %v753_v48 = vunpack.c.l.b16 %v481_v40  ;;  %v562_v15 = vld [vmem:[%s4733_s14 + $0x260] sm:$0xff]  ;;  %v484_v57 = vpack.c.bf16 %v474_v56, %v474_v56  ;;  %v750_v62 = vunpack.c.l.b16 %v478_v19  ;;  %v675_v34 = vld [vmem:[%s4733_s14 + $0x5e8] sm:$0xff] }
  0x5d   : > { %v686_v16 = vld [vmem:[%s4733_s14 + $0x640] sm:$0xff]  ;;  %v3945_v21 = vcombine.high %v558_v9, %v562_v15  ;;  %2118 = vmatprep.subr.bf16.mxu1 %v4081_v6  ;;  %v3944_v26 = vcombine.low %v558_v9, %v562_v15  ;;  %v754_v63 = vunpack.c.l.b16 %v482_v20  ;;  %v752_v28 = vunpack.c.l.b16 %v480_v22  ;;  %v527_v51 = vld [vmem:[%s4733_s14 + $0x148] sm:$0xff] }
  0x5e   : > { %v760_v52 = vsel %vm758_vm1, %v755_v47, %v751_v46  ;;  %v762_v1 = vsel %vm758_vm1, %v757_v49, %v753_v48  ;;  %v690_v17 = vld [vmem:[%s4733_s14 + $0x660] sm:$0xff]  ;;  %2078 = vmatpush2.bf16.msra.mxu0 %v3952_v10  ;;  %v756_v29 = vunpack.c.l.b16 %v484_v57  ;;  %v3931_v39 = vcombine.high %v543_v31, %v547_v32  ;;  %v655_v53 = vld [vmem:[%s4733_s14 + $0x548] sm:$0xff] }
  0x5f   : > { %v4888_v0 = vpack.c.b16 %v760_v52, %v760_v52  ;;  %v4893_v4 = vpack.c.b16 %v762_v1, %v762_v1  ;;  %v4073_v61 = vcombine.high %v686_v16, %v690_v17  ;;  %v550_v13 = vld [vmem:[%s4733_s14 + $0x200] sm:$0xff]  ;;  %2119 = vmatpush2.bf16.msra.mxu1 %v4080_v18  ;;  %2079 = vmatprep.subr.bf16.mxu0 %v3945_v21  ;;  %v531_v52 = vld [vmem:[%s4733_s14 + $0x168] sm:$0xff] }
  0x60   : > { %v554_v23 = vld [vmem:[%s4733_s14 + $0x220] sm:$0xff]  ;;  %v4072_v14 = vcombine.low %v686_v16, %v690_v17  ;;  %v759_v36 = vsel %vm758_vm1, %v754_v63, %v750_v62  ;;  %v761_v38 = vsel %vm758_vm1, %v756_v29, %v752_v28  ;;  %v4059_v40 = vcombine.high %v671_v33, %v675_v34  ;;  %v659_v54 = vld [vmem:[%s4733_s14 + $0x568] sm:$0xff] }
  0x61   : > { %2083 = vmatprep.mubr.bf16.mxu0 %v4888_v0  ;;  %2124 = vmatprep.mubr.bf16.mxu1 %v4893_v4  ;;  %v678_v24 = vld [vmem:[%s4733_s14 + $0x600] sm:$0xff]  ;;  %v3937_v27 = vcombine.high %v550_v13, %v554_v23  ;;  %v3936_v35 = vcombine.low %v550_v13, %v554_v23  ;;  %v4913_v43 = vpack.c.b16 %v759_v36, %v759_v36  ;;  %v519_v2 = vld [vmem:[%s4733_s14 + $0x108] sm:$0xff] }
  0x62   : > { %v682_v25 = vld [vmem:[%s4733_s14 + $0x620] sm:$0xff]  ;;  %2120 = vmatprep.subr.bf16.mxu1 %v4073_v61  ;;  %2080 = vmatpush2.bf16.msra.mxu0 %v3944_v26  ;;  %v4917_v46 = vpack.c.b16 %v761_v38, %v761_v38  ;;  %v3930_v47 = vcombine.low %v543_v31, %v547_v32  ;;  %v4058_v48 = vcombine.low %v671_v33, %v675_v34  ;;  %v523_v3 = vld [vmem:[%s4733_s14 + $0x128] sm:$0xff] }
  0x63   : > { %v4065_v30 = vcombine.high %v678_v24, %v682_v25  ;;  %2121 = vmatpush2.bf16.msra.mxu1 %v4072_v14  ;;  %2081 = vmatprep.subr.bf16.mxu0 %v3937_v27  ;;  %v4064_v37 = vcombine.low %v678_v24, %v682_v25  ;;  %v3923_v49 = vcombine.high %v535_v41, %v539_v42  ;;  %v647_v5 = vld [vmem:[%s4733_s14 + $0x508] sm:$0xff] }
  0x64   : > { %v4051_v50 = vcombine.high %v663_v44, %v667_v45  ;;  %v3922_v58 = vcombine.low %v535_v41, %v539_v42  ;;  %v4050_v59 = vcombine.low %v663_v44, %v667_v45  ;;  %v3915_v60 = vcombine.high %v527_v51, %v531_v52  ;;  %v651_v7 = vld [vmem:[%s4733_s14 + $0x528] sm:$0xff] }
  0x65   : > { %2122 = vmatprep.subr.bf16.mxu1 %v4065_v30  ;;  %v4043_v1 = vcombine.high %v655_v53, %v659_v54  ;;  %v3914_v8 = vcombine.low %v527_v51, %v531_v52  ;;  %v4042_v11 = vcombine.low %v655_v53, %v659_v54  ;;  %v3907_v12 = vcombine.high %v519_v2, %v523_v3  ;;  %v511_v56 = vld [vmem:[%s4733_s14 + $0xc8] sm:$0xff] }
  0x66   : > { %2082 = vmatpush2.bf16.msra.mxu0 %v3936_v35  ;;  %v4035_v55 = vcombine.high %v647_v5, %v651_v7  ;;  %v515_v6 = vld [vmem:[%s4733_s14 + $0xe8] sm:$0xff]  ;;  %v3906_v16 = vcombine.low %v519_v2, %v523_v3  ;;  %v4034_v17 = vcombine.low %v647_v5, %v651_v7 }
  0x67   : > { %2123 = vmatpush2.bf16.msra.mxu1 %v4064_v37  ;;  %2133 = vmatprep.subr.bf16.mxu0 %v3931_v39  ;;  %v639_v9 = vld [vmem:[%s4733_s14 + $0x4c8] sm:$0xff]  ;;  %v3899_v10 = vcombine.high %v511_v56, %v515_v6  ;;  %v3898_v57 = vcombine.low %v511_v56, %v515_v6 }
  0x68   : > { %2174 = vmatprep.subr.bf16.mxu1 %v4059_v40  ;;  %v643_v15 = vld [vmem:[%s4733_s14 + $0x4e8] sm:$0xff] }
  0x69   : > { %2084 = vmatmul.mubr.bf16.vlgmr.msra.gmra.mxu0 %v4913_v43  ;;  %v4027_v18 = vcombine.high %v639_v9, %v643_v15  ;;  %v503_v19 = vld [vmem:[%s4733_s14 + $0x88] sm:$0xff]  ;;  %v4026_v61 = vcombine.low %v639_v9, %v643_v15 }
  0x6a   : > { %2125 = vmatmul.mubr.bf16.vlgmr.msra.gmra.mxu1 %v4917_v46  ;;  %2134 = vmatpush1.bf16.msra.mxu0 %v3930_v47  ;;  %v507_v20 = vld [vmem:[%s4733_s14 + $0xa8] sm:$0xff] }
  0x6b   : > { %2175 = vmatpush1.bf16.msra.mxu1 %v4058_v48  ;;  %2135 = vmatprep.subr.bf16.mxu0 %v3923_v49  ;;  %v631_v21 = vld [vmem:[%s4733_s14 + $0x488] sm:$0xff]  ;;  %v3891_v13 = vcombine.high %v503_v19, %v507_v20  ;;  %v3890_v63 = vcombine.low %v503_v19, %v507_v20 }
  0x6c   : > { %2176 = vmatprep.subr.bf16.mxu1 %v4051_v50  ;;  %2165 = vmatprep.mubr.bf16.mxu0 %v4888_v0  ;;  %v635_v22 = vld [vmem:[%s4733_s14 + $0x4a8] sm:$0xff] }
  0x6d   : > { %2206 = vmatprep.mubr.bf16.mxu1 %v4893_v4  ;;  %v4019_v23 = vcombine.high %v631_v21, %v635_v22  ;;  %v495_v24 = vld [vmem:[%s4733_s14 + $0x48] sm:$0xff]  ;;  %v4018_v14 = vcombine.low %v631_v21, %v635_v22 }
  0x6e   : > { %2136 = vmatpush1.bf16.msra.mxu0 %v3922_v58  ;;  %v499_v25 = vld [vmem:[%s4733_s14 + $0x68] sm:$0xff] }
  0x6f   : > { %2177 = vmatpush1.bf16.msra.mxu1 %v4050_v59  ;;  %2137 = vmatprep.subr.bf16.mxu0 %v3915_v60  ;;  %v623_v26 = vld [vmem:[%s4733_s14 + $0x448] sm:$0xff]  ;;  %v3883_v27 = vcombine.high %v495_v24, %v499_v25  ;;  %v3882_v33 = vcombine.low %v495_v24, %v499_v25 }
  0x70   : > { %2178 = vmatprep.subr.bf16.mxu1 %v4043_v1  ;;  %v627_v62 = vld [vmem:[%s4733_s14 + $0x468] sm:$0xff] }
  0x71   : > { %v4011_v28 = vcombine.high %v623_v26, %v627_v62  ;;  %v487_v29 = vld [vmem:[%s4733_s14 + $0x8] sm:$0xff]  ;;  %v4010_v34 = vcombine.low %v623_v26, %v627_v62 }
  0x72   : > { %2138 = vmatpush1.bf16.msra.mxu0 %v3914_v8  ;;  %v491_v30 = vld [vmem:[%s4733_s14 + $0x28] sm:$0xff] }
  0x73   : > { %2179 = vmatpush1.bf16.msra.mxu1 %v4042_v11  ;;  %2139 = vmatprep.subr.bf16.mxu0 %v3907_v12  ;;  %v615_v31 = vld [vmem:[%s4733_s14 + $0x408] sm:$0xff]  ;;  %v3875_v35 = vcombine.high %v487_v29, %v491_v30  ;;  %v3874_v41 = vcombine.low %v487_v29, %v491_v30 }
  0x74   : > { %2180 = vmatprep.subr.bf16.mxu1 %v4035_v55  ;;  %v619_v32 = vld [vmem:[%s4733_s14 + $0x428] sm:$0xff] }
  0x75   : > { %v4003_v36 = vcombine.high %v615_v31, %v619_v32  ;;  %v607_v37 = vld [vmem:[%s4733_s14 + $0x3c8] sm:$0xff]  ;;  %v4002_v42 = vcombine.low %v615_v31, %v619_v32 }
  0x76   : > { %2140 = vmatpush1.bf16.msra.mxu0 %v3906_v16  ;;  %v611_v38 = vld [vmem:[%s4733_s14 + $0x3e8] sm:$0xff] }
  0x77   : > { %2181 = vmatpush1.bf16.msra.mxu1 %v4034_v17  ;;  %2141 = vmatprep.subr.bf16.mxu0 %v3899_v10  ;;  %v735_v39 = vld [vmem:[%s4733_s14 + $0x7c8] sm:$0xff]  ;;  %v3995_v44 = vcombine.high %v607_v37, %v611_v38  ;;  %v3994_v51 = vcombine.low %v607_v37, %v611_v38 }
  0x78   : > { %2182 = vmatprep.subr.bf16.mxu1 %v4027_v18  ;;  %v739_v40 = vld [vmem:[%s4733_s14 + $0x7e8] sm:$0xff] }
  0x79   : > { %v4123_v45 = vcombine.high %v735_v39, %v739_v40  ;;  %v599_v47 = vld [vmem:[%s4733_s14 + $0x388] sm:$0xff]  ;;  %v4122_v52 = vcombine.low %v735_v39, %v739_v40 }
  0x7a   : > { %2142 = vmatpush1.bf16.msra.mxu0 %v3898_v57  ;;  %v603_v48 = vld [vmem:[%s4733_s14 + $0x3a8] sm:$0xff] }
  0x7b   : > { %2183 = vmatpush1.bf16.msra.mxu1 %v4026_v61  ;;  %2143 = vmatprep.subr.bf16.mxu0 %v3891_v13  ;;  %v727_v49 = vld [vmem:[%s4733_s14 + $0x788] sm:$0xff]  ;;  %v3987_v53 = vcombine.high %v599_v47, %v603_v48  ;;  %v3986_v2 = vcombine.low %v599_v47, %v603_v48 }
  0x7c   : > { %2184 = vmatprep.subr.bf16.mxu1 %v4019_v23  ;;  %v731_v50 = vld [vmem:[%s4733_s14 + $0x7a8] sm:$0xff] }
  0x7d   : > { %v4115_v54 = vcombine.high %v727_v49, %v731_v50  ;;  %v591_v58 = vld [vmem:[%s4733_s14 + $0x348] sm:$0xff]  ;;  %v4114_v3 = vcombine.low %v727_v49, %v731_v50 }
  0x7e   : > { %2144 = vmatpush1.bf16.msra.mxu0 %v3890_v63  ;;  %v595_v59 = vld [vmem:[%s4733_s14 + $0x368] sm:$0xff] }
  0x7f   : > { %2185 = vmatpush1.bf16.msra.mxu1 %v4018_v14  ;;  %2145 = vmatprep.subr.bf16.mxu0 %v3883_v27  ;;  %v719_v60 = vld [vmem:[%s4733_s14 + $0x748] sm:$0xff]  ;;  %v3979_v5 = vcombine.high %v591_v58, %v595_v59  ;;  %v3978_v56 = vcombine.low %v591_v58, %v595_v59 }
  0x80   : > { %2186 = vmatprep.subr.bf16.mxu1 %v4011_v28  ;;  %v723_v1 = vld [vmem:[%s4733_s14 + $0x768] sm:$0xff] }
  0x81   : > { %v4107_v7 = vcombine.high %v719_v60, %v723_v1  ;;  %v583_v8 = vld [vmem:[%s4733_s14 + $0x308] sm:$0xff]  ;;  %v4106_v6 = vcombine.low %v719_v60, %v723_v1 }
  0x82   : > { %2146 = vmatpush1.bf16.msra.mxu0 %v3882_v33  ;;  %v587_v11 = vld [vmem:[%s4733_s14 + $0x328] sm:$0xff] }
  0x83   : > { %2187 = vmatpush1.bf16.msra.mxu1 %v4010_v34  ;;  %2147 = vmatprep.subr.bf16.mxu0 %v3875_v35  ;;  %v711_v12 = vld [vmem:[%s4733_s14 + $0x708] sm:$0xff]  ;;  %v3971_v9 = vcombine.high %v583_v8, %v587_v11  ;;  %v3970_v19 = vcombine.low %v583_v8, %v587_v11 }
  0x84   : > { %2188 = vmatprep.subr.bf16.mxu1 %v4003_v36  ;;  %v715_v55 = vld [vmem:[%s4733_s14 + $0x728] sm:$0xff] }
  0x85   : > { %v4099_v15 = vcombine.high %v711_v12, %v715_v55  ;;  %v575_v16 = vld [vmem:[%s4733_s14 + $0x2c8] sm:$0xff]  ;;  %v4098_v20 = vcombine.low %v711_v12, %v715_v55 }
  0x86   : > { %2148 = vmatpush1.bf16.msra.mxu0 %v3874_v41  ;;  %v579_v17 = vld [vmem:[%s4733_s14 + $0x2e8] sm:$0xff]  ;;  %v544_v41 = vld [vmem:[%s4733_s14 + $0x1d0] sm:$0xff] }
  0x87   : > { %2189 = vmatpush1.bf16.msra.mxu1 %v4002_v42  ;;  %2149 = vmatprep.subr.bf16.mxu0 %v3995_v44  ;;  %v703_v10 = vld [vmem:[%s4733_s14 + $0x6c8] sm:$0xff]  ;;  %v3963_v21 = vcombine.high %v575_v16, %v579_v17  ;;  %v3962_v24 = vcombine.low %v575_v16, %v579_v17  ;;  %v548_v42 = vld [vmem:[%s4733_s14 + $0x1f0] sm:$0xff] }
  0x88   : > { %2190 = vmatprep.subr.bf16.mxu1 %v4123_v45  ;;  %v707_v18 = vld [vmem:[%s4733_s14 + $0x6e8] sm:$0xff]  ;;  %v672_v44 = vld [vmem:[%s4733_s14 + $0x5d0] sm:$0xff]  ;;  %v3933_v49 = vcombine.high %v544_v41, %v548_v42  ;;  %v3932_v58 = vcombine.low %v544_v41, %v548_v42 }
  0x89   : > { %v4091_v22 = vcombine.high %v703_v10, %v707_v18  ;;  %v567_v57 = vld [vmem:[%s4733_s14 + $0x288] sm:$0xff]  ;;  %v4090_v25 = vcombine.low %v703_v10, %v707_v18  ;;  %v676_v45 = vld [vmem:[%s4733_s14 + $0x5f0] sm:$0xff] }
  0x8a   : > { %2150 = vmatpush2.bf16.msra.mxu0 %v3994_v51  ;;  %v571_v61 = vld [vmem:[%s4733_s14 + $0x2a8] sm:$0xff]  ;;  %v4061_v50 = vcombine.high %v672_v44, %v676_v45  ;;  %v536_v51 = vld [vmem:[%s4733_s14 + $0x190] sm:$0xff]  ;;  %v4060_v59 = vcombine.low %v672_v44, %v676_v45 }
  0x8b   : > { %2191 = vmatpush2.bf16.msra.mxu1 %v4122_v52  ;;  %2151 = vmatprep.subr.bf16.mxu0 %v3987_v53  ;;  %v695_v13 = vld [vmem:[%s4733_s14 + $0x688] sm:$0xff]  ;;  %v3955_v26 = vcombine.high %v567_v57, %v571_v61  ;;  %v3954_v29 = vcombine.low %v567_v57, %v571_v61  ;;  %v540_v52 = vld [vmem:[%s4733_s14 + $0x1b0] sm:$0xff] }
  0x8c   : > { %2192 = vmatprep.subr.bf16.mxu1 %v4115_v54  ;;  %v699_v23 = vld [vmem:[%s4733_s14 + $0x6a8] sm:$0xff]  ;;  %v664_v53 = vld [vmem:[%s4733_s14 + $0x590] sm:$0xff]  ;;  %v3925_v60 = vcombine.high %v536_v51, %v540_v52  ;;  %v3924_v8 = vcombine.low %v536_v51, %v540_v52 }
  0x8d   : > { %v4083_v62 = vcombine.high %v695_v13, %v699_v23  ;;  %v559_v63 = vld [vmem:[%s4733_s14 + $0x248] sm:$0xff]  ;;  %v4082_v30 = vcombine.low %v695_v13, %v699_v23  ;;  %v668_v54 = vld [vmem:[%s4733_s14 + $0x5b0] sm:$0xff] }
  0x8e   : > { %2152 = vmatpush2.bf16.msra.mxu0 %v3986_v2  ;;  %v563_v14 = vld [vmem:[%s4733_s14 + $0x268] sm:$0xff]  ;;  %v4053_v1 = vcombine.high %v664_v53, %v668_v54  ;;  %v528_v2 = vld [vmem:[%s4733_s14 + $0x150] sm:$0xff]  ;;  %v4052_v11 = vcombine.low %v664_v53, %v668_v54 }
  0x8f   : > { %2193 = vmatpush2.bf16.msra.mxu1 %v4114_v3  ;;  %2153 = vmatprep.subr.bf16.mxu0 %v3979_v5  ;;  %v687_v27 = vld [vmem:[%s4733_s14 + $0x648] sm:$0xff]  ;;  %v3947_v31 = vcombine.high %v559_v63, %v563_v14  ;;  %v3946_v37 = vcombine.low %v559_v63, %v563_v14  ;;  %v532_v3 = vld [vmem:[%s4733_s14 + $0x170] sm:$0xff] }
  0x90   : > { %2194 = vmatprep.subr.bf16.mxu1 %v4107_v7  ;;  %v691_v28 = vld [vmem:[%s4733_s14 + $0x668] sm:$0xff]  ;;  %v656_v5 = vld [vmem:[%s4733_s14 + $0x550] sm:$0xff]  ;;  %v3917_v12 = vcombine.high %v528_v2, %v532_v3  ;;  %v3916_v16 = vcombine.low %v528_v2, %v532_v3 }
  0x91   : > { %v4075_v32 = vcombine.high %v687_v27, %v691_v28  ;;  %v551_v33 = vld [vmem:[%s4733_s14 + $0x208] sm:$0xff]  ;;  %v4074_v38 = vcombine.low %v687_v27, %v691_v28  ;;  %v660_v7 = vld [vmem:[%s4733_s14 + $0x570] sm:$0xff] }
  0x92   : > { %2154 = vmatpush2.bf16.msra.mxu0 %v3978_v56  ;;  %v555_v34 = vld [vmem:[%s4733_s14 + $0x228] sm:$0xff]  ;;  %v4045_v55 = vcombine.high %v656_v5, %v660_v7  ;;  %v520_v56 = vld [vmem:[%s4733_s14 + $0x110] sm:$0xff]  ;;  %v4044_v17 = vcombine.low %v656_v5, %v660_v7 }
  0x93   : > { %2195 = vmatpush2.bf16.msra.mxu1 %v4106_v6  ;;  %2155 = vmatprep.subr.bf16.mxu0 %v3971_v9  ;;  %v679_v35 = vld [vmem:[%s4733_s14 + $0x608] sm:$0xff]  ;;  %v3939_v39 = vcombine.high %v551_v33, %v555_v34  ;;  %v3938_v47 = vcombine.low %v551_v33, %v555_v34  ;;  %v524_v6 = vld [vmem:[%s4733_s14 + $0x130] sm:$0xff] }
  0x94   : > { %2196 = vmatprep.subr.bf16.mxu1 %v4099_v15  ;;  %v683_v36 = vld [vmem:[%s4733_s14 + $0x628] sm:$0xff]  ;;  %v648_v9 = vld [vmem:[%s4733_s14 + $0x510] sm:$0xff]  ;;  %v3909_v10 = vcombine.high %v520_v56, %v524_v6  ;;  %v3908_v57 = vcombine.low %v520_v56, %v524_v6 }
  0x95   : > { %v4067_v40 = vcombine.high %v679_v35, %v683_v36  ;;  %v4066_v48 = vcombine.low %v679_v35, %v683_v36  ;;  %v652_v15 = vld [vmem:[%s4733_s14 + $0x530] sm:$0xff] }
  0x96   : > { %2156 = vmatpush2.bf16.msra.mxu0 %v3970_v19  ;;  %v4037_v18 = vcombine.high %v648_v9, %v652_v15  ;;  %v512_v19 = vld [vmem:[%s4733_s14 + $0xd0] sm:$0xff]  ;;  %v4036_v61 = vcombine.low %v648_v9, %v652_v15 }
  0x97   : > { %2197 = vmatpush2.bf16.msra.mxu1 %v4098_v20  ;;  %2157 = vmatprep.subr.bf16.mxu0 %v3963_v21  ;;  %v516_v20 = vld [vmem:[%s4733_s14 + $0xf0] sm:$0xff] }
  0x98   : > { %2198 = vmatprep.subr.bf16.mxu1 %v4091_v22  ;;  %v640_v21 = vld [vmem:[%s4733_s14 + $0x4d0] sm:$0xff]  ;;  %v3901_v13 = vcombine.high %v512_v19, %v516_v20  ;;  %v3900_v63 = vcombine.low %v512_v19, %v516_v20 }
  0x99   : > { %v644_v22 = vld [vmem:[%s4733_s14 + $0x4f0] sm:$0xff] }
  0x9a   : > { %2158 = vmatpush2.bf16.msra.mxu0 %v3962_v24  ;;  %v4029_v23 = vcombine.high %v640_v21, %v644_v22  ;;  %v504_v24 = vld [vmem:[%s4733_s14 + $0x90] sm:$0xff]  ;;  %v4028_v14 = vcombine.low %v640_v21, %v644_v22 }
  0x9b   : > { %2199 = vmatpush2.bf16.msra.mxu1 %v4090_v25  ;;  %2159 = vmatprep.subr.bf16.mxu0 %v3955_v26  ;;  %v508_v25 = vld [vmem:[%s4733_s14 + $0xb0] sm:$0xff] }
  0x9c   : > { %2200 = vmatprep.subr.bf16.mxu1 %v4083_v62  ;;  %v632_v26 = vld [vmem:[%s4733_s14 + $0x490] sm:$0xff]  ;;  %v3893_v27 = vcombine.high %v504_v24, %v508_v25  ;;  %v3892_v33 = vcombine.low %v504_v24, %v508_v25 }
  0x9d   : > { %v636_v62 = vld [vmem:[%s4733_s14 + $0x4b0] sm:$0xff] }
  0x9e   : > { %2160 = vmatpush2.bf16.msra.mxu0 %v3954_v29  ;;  %v4021_v28 = vcombine.high %v632_v26, %v636_v62  ;;  %v496_v29 = vld [vmem:[%s4733_s14 + $0x50] sm:$0xff]  ;;  %v4020_v34 = vcombine.low %v632_v26, %v636_v62 }
  0x9f   : > { %2201 = vmatpush2.bf16.msra.mxu1 %v4082_v30  ;;  %2161 = vmatprep.subr.bf16.mxu0 %v3947_v31  ;;  %v500_v30 = vld [vmem:[%s4733_s14 + $0x70] sm:$0xff] }
  0xa0   : > { %2202 = vmatprep.subr.bf16.mxu1 %v4075_v32  ;;  %v624_v31 = vld [vmem:[%s4733_s14 + $0x450] sm:$0xff]  ;;  %v3885_v35 = vcombine.high %v496_v29, %v500_v30  ;;  %v3884_v41 = vcombine.low %v496_v29, %v500_v30 }
  0xa1   : > { %v628_v32 = vld [vmem:[%s4733_s14 + $0x470] sm:$0xff] }
  0xa2   : > { %2162 = vmatpush2.bf16.msra.mxu0 %v3946_v37  ;;  %v4013_v36 = vcombine.high %v624_v31, %v628_v32  ;;  %v488_v37 = vld [vmem:[%s4733_s14 + $0x10] sm:$0xff]  ;;  %v4012_v42 = vcombine.low %v624_v31, %v628_v32 }
  0xa3   : > { %2203 = vmatpush2.bf16.msra.mxu1 %v4074_v38  ;;  %2163 = vmatprep.subr.bf16.mxu0 %v3939_v39  ;;  %v492_v38 = vld [vmem:[%s4733_s14 + $0x30] sm:$0xff] }
  0xa4   : > { %2204 = vmatprep.subr.bf16.mxu1 %v4067_v40  ;;  %v616_v39 = vld [vmem:[%s4733_s14 + $0x410] sm:$0xff]  ;;  %v3877_v44 = vcombine.high %v488_v37, %v492_v38  ;;  %v3876_v51 = vcombine.low %v488_v37, %v492_v38 }
  0xa5   : > { %v620_v40 = vld [vmem:[%s4733_s14 + $0x430] sm:$0xff] }
  0xa6   : > { %2164 = vmatpush2.bf16.msra.mxu0 %v3938_v47  ;;  %v4005_v45 = vcombine.high %v616_v39, %v620_v40  ;;  %v608_v47 = vld [vmem:[%s4733_s14 + $0x3d0] sm:$0xff]  ;;  %v4004_v52 = vcombine.low %v616_v39, %v620_v40 }
  0xa7   : > { %2205 = vmatpush2.bf16.msra.mxu1 %v4066_v48  ;;  %2215 = vmatprep.subr.bf16.mxu0 %v3933_v49  ;;  %v612_v48 = vld [vmem:[%s4733_s14 + $0x3f0] sm:$0xff] }
  0xa8   : > { %2256 = vmatprep.subr.bf16.mxu1 %v4061_v50  ;;  %v736_v49 = vld [vmem:[%s4733_s14 + $0x7d0] sm:$0xff]  ;;  %v3997_v53 = vcombine.high %v608_v47, %v612_v48  ;;  %v3996_v2 = vcombine.low %v608_v47, %v612_v48 }
  0xa9   : > { %2166 = vmatmul.mubr.bf16.vlgmr.msra.gmra.mxu0 %v4913_v43  ;;  %v740_v50 = vld [vmem:[%s4733_s14 + $0x7f0] sm:$0xff] }
  0xaa   : > { %2207 = vmatmul.mubr.bf16.vlgmr.msra.gmra.mxu1 %v4917_v46  ;;  %2216 = vmatpush1.bf16.msra.mxu0 %v3932_v58  ;;  %v4125_v54 = vcombine.high %v736_v49, %v740_v50  ;;  %v600_v58 = vld [vmem:[%s4733_s14 + $0x390] sm:$0xff]  ;;  %v4124_v3 = vcombine.low %v736_v49, %v740_v50 }
  0xab   : > { %2257 = vmatpush1.bf16.msra.mxu1 %v4060_v59  ;;  %2217 = vmatprep.subr.bf16.mxu0 %v3925_v60  ;;  %v604_v59 = vld [vmem:[%s4733_s14 + $0x3b0] sm:$0xff] }
  0xac   : > { %2258 = vmatprep.subr.bf16.mxu1 %v4053_v1  ;;  %2247 = vmatprep.mubr.bf16.mxu0 %v4888_v0  ;;  %v728_v60 = vld [vmem:[%s4733_s14 + $0x790] sm:$0xff]  ;;  %v3989_v5 = vcombine.high %v600_v58, %v604_v59  ;;  %v3988_v56 = vcombine.low %v600_v58, %v604_v59 }
  0xad   : > { %2288 = vmatprep.mubr.bf16.mxu1 %v4893_v4  ;;  %v732_v1 = vld [vmem:[%s4733_s14 + $0x7b0] sm:$0xff] }
  0xae   : > { %2218 = vmatpush1.bf16.msra.mxu0 %v3924_v8  ;;  %v4117_v7 = vcombine.high %v728_v60, %v732_v1  ;;  %v592_v8 = vld [vmem:[%s4733_s14 + $0x350] sm:$0xff]  ;;  %v4116_v6 = vcombine.low %v728_v60, %v732_v1 }
  0xaf   : > { %2259 = vmatpush1.bf16.msra.mxu1 %v4052_v11  ;;  %2219 = vmatprep.subr.bf16.mxu0 %v3917_v12  ;;  %v596_v11 = vld [vmem:[%s4733_s14 + $0x370] sm:$0xff] }
  0xb0   : > { %2260 = vmatprep.subr.bf16.mxu1 %v4045_v55  ;;  %v720_v12 = vld [vmem:[%s4733_s14 + $0x750] sm:$0xff]  ;;  %v3981_v9 = vcombine.high %v592_v8, %v596_v11  ;;  %v3980_v19 = vcombine.low %v592_v8, %v596_v11 }
  0xb1   : > { %v724_v55 = vld [vmem:[%s4733_s14 + $0x770] sm:$0xff] }
  0xb2   : > { %2220 = vmatpush1.bf16.msra.mxu0 %v3916_v16  ;;  %v4109_v15 = vcombine.high %v720_v12, %v724_v55  ;;  %v584_v16 = vld [vmem:[%s4733_s14 + $0x310] sm:$0xff]  ;;  %v4108_v20 = vcombine.low %v720_v12, %v724_v55 }
  0xb3   : > { %2261 = vmatpush1.bf16.msra.mxu1 %v4044_v17  ;;  %2221 = vmatprep.subr.bf16.mxu0 %v3909_v10  ;;  %v588_v17 = vld [vmem:[%s4733_s14 + $0x330] sm:$0xff] }
  0xb4   : > { %2262 = vmatprep.subr.bf16.mxu1 %v4037_v18  ;;  %v712_v10 = vld [vmem:[%s4733_s14 + $0x710] sm:$0xff]  ;;  %v3973_v21 = vcombine.high %v584_v16, %v588_v17  ;;  %v3972_v24 = vcombine.low %v584_v16, %v588_v17 }
  0xb5   : > { %v716_v18 = vld [vmem:[%s4733_s14 + $0x730] sm:$0xff] }
  0xb6   : > { %2222 = vmatpush1.bf16.msra.mxu0 %v3908_v57  ;;  %v4101_v22 = vcombine.high %v712_v10, %v716_v18  ;;  %v576_v57 = vld [vmem:[%s4733_s14 + $0x2d0] sm:$0xff]  ;;  %v4100_v25 = vcombine.low %v712_v10, %v716_v18 }
  0xb7   : > { %2263 = vmatpush1.bf16.msra.mxu1 %v4036_v61  ;;  %2223 = vmatprep.subr.bf16.mxu0 %v3901_v13  ;;  %v580_v61 = vld [vmem:[%s4733_s14 + $0x2f0] sm:$0xff] }
  0xb8   : > { %2264 = vmatprep.subr.bf16.mxu1 %v4029_v23  ;;  %v704_v13 = vld [vmem:[%s4733_s14 + $0x6d0] sm:$0xff]  ;;  %v3965_v26 = vcombine.high %v576_v57, %v580_v61  ;;  %v3964_v29 = vcombine.low %v576_v57, %v580_v61 }
  0xb9   : > { %v708_v23 = vld [vmem:[%s4733_s14 + $0x6f0] sm:$0xff] }
  0xba   : > { %2224 = vmatpush1.bf16.msra.mxu0 %v3900_v63  ;;  %v4093_v62 = vcombine.high %v704_v13, %v708_v23  ;;  %v568_v63 = vld [vmem:[%s4733_s14 + $0x290] sm:$0xff]  ;;  %v4092_v30 = vcombine.low %v704_v13, %v708_v23 }
  0xbb   : > { %2265 = vmatpush1.bf16.msra.mxu1 %v4028_v14  ;;  %2225 = vmatprep.subr.bf16.mxu0 %v3893_v27  ;;  %v572_v14 = vld [vmem:[%s4733_s14 + $0x2b0] sm:$0xff] }
  0xbc   : > { %2266 = vmatprep.subr.bf16.mxu1 %v4021_v28  ;;  %v696_v27 = vld [vmem:[%s4733_s14 + $0x690] sm:$0xff]  ;;  %v3957_v31 = vcombine.high %v568_v63, %v572_v14  ;;  %v3956_v37 = vcombine.low %v568_v63, %v572_v14 }
  0xbd   : > { %v700_v28 = vld [vmem:[%s4733_s14 + $0x6b0] sm:$0xff] }
  0xbe   : > { %2226 = vmatpush1.bf16.msra.mxu0 %v3892_v33  ;;  %v4085_v32 = vcombine.high %v696_v27, %v700_v28  ;;  %v560_v33 = vld [vmem:[%s4733_s14 + $0x250] sm:$0xff]  ;;  %v4084_v38 = vcombine.low %v696_v27, %v700_v28  ;;  %v505_v27 = vld [vmem:[%s4733_s14 + $0x98] sm:$0xff] }
  0xbf   : > { %2267 = vmatpush1.bf16.msra.mxu1 %v4020_v34  ;;  %2227 = vmatprep.subr.bf16.mxu0 %v3885_v35  ;;  %v564_v34 = vld [vmem:[%s4733_s14 + $0x270] sm:$0xff]  ;;  %v509_v28 = vld [vmem:[%s4733_s14 + $0xb8] sm:$0xff] }
  0xc0   : > { %2268 = vmatprep.subr.bf16.mxu1 %v4013_v36  ;;  %v688_v35 = vld [vmem:[%s4733_s14 + $0x650] sm:$0xff]  ;;  %v3949_v39 = vcombine.high %v560_v33, %v564_v34  ;;  %v3948_v47 = vcombine.low %v560_v33, %v564_v34  ;;  %v3895_v33 = vcombine.high %v505_v27, %v509_v28 }
  0xc1   : > { %v692_v36 = vld [vmem:[%s4733_s14 + $0x670] sm:$0xff] }
  0xc2   : > { %2228 = vmatpush1.bf16.msra.mxu0 %v3884_v41  ;;  %v4077_v40 = vcombine.high %v688_v35, %v692_v36  ;;  %v552_v41 = vld [vmem:[%s4733_s14 + $0x210] sm:$0xff]  ;;  %v4076_v48 = vcombine.low %v688_v35, %v692_v36  ;;  %v497_v35 = vld [vmem:[%s4733_s14 + $0x58] sm:$0xff] }
  0xc3   : > { %2269 = vmatpush1.bf16.msra.mxu1 %v4012_v42  ;;  %2229 = vmatprep.subr.bf16.mxu0 %v3877_v44  ;;  %v556_v42 = vld [vmem:[%s4733_s14 + $0x230] sm:$0xff]  ;;  %v501_v36 = vld [vmem:[%s4733_s14 + $0x78] sm:$0xff] }
  0xc4   : > { %2270 = vmatprep.subr.bf16.mxu1 %v4005_v45  ;;  %v680_v44 = vld [vmem:[%s4733_s14 + $0x610] sm:$0xff]  ;;  %v3941_v49 = vcombine.high %v552_v41, %v556_v42  ;;  %v3940_v58 = vcombine.low %v552_v41, %v556_v42  ;;  %v3887_v41 = vcombine.high %v497_v35, %v501_v36 }
  0xc5   : > { %v684_v45 = vld [vmem:[%s4733_s14 + $0x630] sm:$0xff] }
  0xc6   : > { %2230 = vmatpush1.bf16.msra.mxu0 %v3876_v51  ;;  %v4069_v50 = vcombine.high %v680_v44, %v684_v45  ;;  %v545_v51 = vld [vmem:[%s4733_s14 + $0x1d8] sm:$0xff]  ;;  %v4068_v59 = vcombine.low %v680_v44, %v684_v45 }
  0xc7   : > { %2271 = vmatpush1.bf16.msra.mxu1 %v4004_v52  ;;  %2231 = vmatprep.subr.bf16.mxu0 %v3997_v53  ;;  %v549_v52 = vld [vmem:[%s4733_s14 + $0x1f8] sm:$0xff] }
  0xc8   : > { %2272 = vmatprep.subr.bf16.mxu1 %v4125_v54  ;;  %v673_v53 = vld [vmem:[%s4733_s14 + $0x5d8] sm:$0xff]  ;;  %v3935_v60 = vcombine.high %v545_v51, %v549_v52  ;;  %v3934_v8 = vcombine.low %v545_v51, %v549_v52 }
  0xc9   : > { %v677_v54 = vld [vmem:[%s4733_s14 + $0x5f8] sm:$0xff] }
  0xca   : > { %2232 = vmatpush2.bf16.msra.mxu0 %v3996_v2  ;;  %v4063_v1 = vcombine.high %v673_v53, %v677_v54  ;;  %v537_v2 = vld [vmem:[%s4733_s14 + $0x198] sm:$0xff]  ;;  %v4062_v11 = vcombine.low %v673_v53, %v677_v54 }
  0xcb   : > { %2273 = vmatpush2.bf16.msra.mxu1 %v4124_v3  ;;  %2233 = vmatprep.subr.bf16.mxu0 %v3989_v5  ;;  %v541_v3 = vld [vmem:[%s4733_s14 + $0x1b8] sm:$0xff] }
  0xcc   : > { %2274 = vmatprep.subr.bf16.mxu1 %v4117_v7  ;;  %v665_v5 = vld [vmem:[%s4733_s14 + $0x598] sm:$0xff]  ;;  %v3927_v12 = vcombine.high %v537_v2, %v541_v3  ;;  %v3926_v16 = vcombine.low %v537_v2, %v541_v3 }
  0xcd   : > { %v669_v7 = vld [vmem:[%s4733_s14 + $0x5b8] sm:$0xff] }
  0xce   : > { %2234 = vmatpush2.bf16.msra.mxu0 %v3988_v56  ;;  %v4055_v55 = vcombine.high %v665_v5, %v669_v7  ;;  %v529_v56 = vld [vmem:[%s4733_s14 + $0x158] sm:$0xff]  ;;  %v4054_v17 = vcombine.low %v665_v5, %v669_v7 }
  0xcf   : > { %2275 = vmatpush2.bf16.msra.mxu1 %v4116_v6  ;;  %2235 = vmatprep.subr.bf16.mxu0 %v3981_v9  ;;  %v533_v6 = vld [vmem:[%s4733_s14 + $0x178] sm:$0xff] }
  0xd0   : > { %2276 = vmatprep.subr.bf16.mxu1 %v4109_v15  ;;  %v657_v9 = vld [vmem:[%s4733_s14 + $0x558] sm:$0xff]  ;;  %v3919_v10 = vcombine.high %v529_v56, %v533_v6  ;;  %v3918_v57 = vcombine.low %v529_v56, %v533_v6 }
  0xd1   : > { %v661_v15 = vld [vmem:[%s4733_s14 + $0x578] sm:$0xff] }
  0xd2   : > { %2236 = vmatpush2.bf16.msra.mxu0 %v3980_v19  ;;  %v4047_v18 = vcombine.high %v657_v9, %v661_v15  ;;  %v521_v19 = vld [vmem:[%s4733_s14 + $0x118] sm:$0xff]  ;;  %v4046_v61 = vcombine.low %v657_v9, %v661_v15 }
  0xd3   : > { %2277 = vmatpush2.bf16.msra.mxu1 %v4108_v20  ;;  %2237 = vmatprep.subr.bf16.mxu0 %v3973_v21  ;;  %v525_v20 = vld [vmem:[%s4733_s14 + $0x138] sm:$0xff] }
  0xd4   : > { %2278 = vmatprep.subr.bf16.mxu1 %v4101_v22  ;;  %v649_v21 = vld [vmem:[%s4733_s14 + $0x518] sm:$0xff]  ;;  %v3911_v13 = vcombine.high %v521_v19, %v525_v20 }
  0xd5   : > { %v653_v22 = vld [vmem:[%s4733_s14 + $0x538] sm:$0xff] }
  0xd6   : > { %2238 = vmatpush2.bf16.msra.mxu0 %v3972_v24  ;;  %v4039_v23 = vcombine.high %v649_v21, %v653_v22  ;;  %v513_v24 = vld [vmem:[%s4733_s14 + $0xd8] sm:$0xff] }
  0xd7   : > { %2279 = vmatpush2.bf16.msra.mxu1 %v4100_v25  ;;  %2239 = vmatprep.subr.bf16.mxu0 %v3965_v26  ;;  %v517_v25 = vld [vmem:[%s4733_s14 + $0xf8] sm:$0xff] }
  0xd8   : > { %2280 = vmatprep.subr.bf16.mxu1 %v4093_v62  ;;  %v641_v26 = vld [vmem:[%s4733_s14 + $0x4d8] sm:$0xff]  ;;  %v3910_v62 = vcombine.low %v521_v19, %v525_v20  ;;  %v3903_v63 = vcombine.high %v513_v24, %v517_v25 }
  0xd9   : > { %v489_v44 = vld [vmem:[%s4733_s14 + $0x18] sm:$0xff] }
  0xda   : > { %2240 = vmatpush2.bf16.msra.mxu0 %v3964_v29  ;;  %v633_v29 = vld [vmem:[%s4733_s14 + $0x498] sm:$0xff] }
  0xdb   : > { %2281 = vmatpush2.bf16.msra.mxu1 %v4092_v30  ;;  %2241 = vmatprep.subr.bf16.mxu0 %v3957_v31  ;;  %v637_v30 = vld [vmem:[%s4733_s14 + $0x4b8] sm:$0xff]  ;;  %v3902_v31 = vcombine.low %v513_v24, %v517_v25 }
  0xdc   : > { %2282 = vmatprep.subr.bf16.mxu1 %v4085_v32  ;;  %v4023_v34 = vcombine.high %v633_v29, %v637_v30  ;;  %v493_v45 = vld [vmem:[%s4733_s14 + $0x38] sm:$0xff] }
  0xdd   : > { %v3879_v51 = vcombine.high %v489_v44, %v493_v45  ;;  %v609_v53 = vld [vmem:[%s4733_s14 + $0x3d8] sm:$0xff] }
  0xde   : > { %2242 = vmatpush2.bf16.msra.mxu0 %v3956_v37  ;;  %v625_v37 = vld [vmem:[%s4733_s14 + $0x458] sm:$0xff] }
  0xdf   : > { %2283 = vmatpush2.bf16.msra.mxu1 %v4084_v38  ;;  %2243 = vmatprep.subr.bf16.mxu0 %v3949_v39  ;;  %v629_v38 = vld [vmem:[%s4733_s14 + $0x478] sm:$0xff]  ;;  %v3894_v39 = vcombine.low %v505_v27, %v509_v28 }
  0xe0   : > { %2284 = vmatprep.subr.bf16.mxu1 %v4077_v40  ;;  %v4022_v40 = vcombine.low %v633_v29, %v637_v30  ;;  %v4015_v42 = vcombine.high %v625_v37, %v629_v38  ;;  %v613_v54 = vld [vmem:[%s4733_s14 + $0x3f8] sm:$0xff] }
  0xe1   : > { %v3999_v2 = vcombine.high %v609_v53, %v613_v54  ;;  %v601_v5 = vld [vmem:[%s4733_s14 + $0x398] sm:$0xff] }
  0xe2   : > { %2244 = vmatpush2.bf16.msra.mxu0 %v3948_v47  ;;  %v617_v47 = vld [vmem:[%s4733_s14 + $0x418] sm:$0xff] }
  0xe3   : > { %2285 = vmatpush2.bf16.msra.mxu1 %v4076_v48  ;;  %2245 = vmatprep.subr.bf16.mxu0 %v3941_v49  ;;  %v621_v48 = vld [vmem:[%s4733_s14 + $0x438] sm:$0xff]  ;;  %v3886_v49 = vcombine.low %v497_v35, %v501_v36 }
  0xe4   : > { %2286 = vmatprep.subr.bf16.mxu1 %v4069_v50  ;;  %v4014_v50 = vcombine.low %v625_v37, %v629_v38  ;;  %v4007_v52 = vcombine.high %v617_v47, %v621_v48  ;;  %v605_v7 = vld [vmem:[%s4733_s14 + $0x3b8] sm:$0xff] }
  0xe5   : > { %v3991_v56 = vcombine.high %v601_v5, %v605_v7  ;;  %v593_v9 = vld [vmem:[%s4733_s14 + $0x358] sm:$0xff] }
  0xe6   : > { %2246 = vmatpush2.bf16.msra.mxu0 %v3940_v58  ;;  %v737_v58 = vld [vmem:[%s4733_s14 + $0x7d8] sm:$0xff] }
  0xe7   : > { %2287 = vmatpush2.bf16.msra.mxu1 %v4068_v59  ;;  %2297 = vmatprep.subr.bf16.mxu0 %v3935_v60  ;;  %v741_v59 = vld [vmem:[%s4733_s14 + $0x7f8] sm:$0xff]  ;;  %v3878_v60 = vcombine.low %v489_v44, %v493_v45 }
  0xe8   : > { %2338 = vmatprep.subr.bf16.mxu1 %v4063_v1  ;;  %v4006_v1 = vcombine.low %v617_v47, %v621_v48  ;;  %v4127_v3 = vcombine.high %v737_v58, %v741_v59  ;;  %v597_v15 = vld [vmem:[%s4733_s14 + $0x378] sm:$0xff] }
  0xe9   : > { %2248 = vmatmul.mubr.bf16.vlgmr.msra.gmra.mxu0 %v4913_v43  ;;  %v3983_v19 = vcombine.high %v593_v9, %v597_v15  ;;  %v569_v29 = vld [vmem:[%s4733_s14 + $0x298] sm:$0xff] }
  0xea   : > { %2289 = vmatmul.mubr.bf16.vlgmr.msra.gmra.mxu1 %v4917_v46  ;;  %2298 = vmatpush1.bf16.msra.mxu0 %v3934_v8  ;;  %v729_v8 = vld [vmem:[%s4733_s14 + $0x798] sm:$0xff] }
  0xeb   : > { %2339 = vmatpush1.bf16.msra.mxu1 %v4062_v11  ;;  %2299 = vmatprep.subr.bf16.mxu0 %v3927_v12  ;;  %v733_v11 = vld [vmem:[%s4733_s14 + $0x7b8] sm:$0xff]  ;;  %v3998_v12 = vcombine.low %v609_v53, %v613_v54 }
  0xec   : > { %2340 = vmatprep.subr.bf16.mxu1 %v4055_v55  ;;  %2329 = vmatprep.mubr.bf16.mxu0 %v4888_v0  ;;  %v645_v0 = vld [vmem:[%s4733_s14 + $0x4f8] sm:$0xff]  ;;  %v4126_v55 = vcombine.low %v737_v58, %v741_v59  ;;  %v4119_v6 = vcombine.high %v729_v8, %v733_v11 }
  0xed   : > { %2370 = vmatprep.mubr.bf16.mxu1 %v4893_v4  ;;  %v4038_v4 = vcombine.low %v649_v21, %v653_v22  ;;  %v4031_v14 = vcombine.high %v641_v26, %v645_v0  ;;  %v4030_v32 = vcombine.low %v641_v26, %v645_v0  ;;  %v585_v21 = vld [vmem:[%s4733_s14 + $0x318] sm:$0xff] }
  0xee   : > { %2300 = vmatpush1.bf16.msra.mxu0 %v3926_v16  ;;  %v721_v16 = vld [vmem:[%s4733_s14 + $0x758] sm:$0xff] }
  0xef   : > { %2341 = vmatpush1.bf16.msra.mxu1 %v4054_v17  ;;  %2301 = vmatprep.subr.bf16.mxu0 %v3919_v10  ;;  %v725_v17 = vld [vmem:[%s4733_s14 + $0x778] sm:$0xff]  ;;  %v3990_v10 = vcombine.low %v601_v5, %v605_v7 }
  0xf0   : > { %2342 = vmatprep.subr.bf16.mxu1 %v4047_v18  ;;  %v4118_v18 = vcombine.low %v729_v8, %v733_v11  ;;  %v4111_v20 = vcombine.high %v721_v16, %v725_v17  ;;  %v589_v22 = vld [vmem:[%s4733_s14 + $0x338] sm:$0xff] }
  0xf1   : > { %v3975_v24 = vcombine.high %v585_v21, %v589_v22  ;;  %v577_v26 = vld [vmem:[%s4733_s14 + $0x2d8] sm:$0xff] }
  0xf2   : > { %2302 = vmatpush1.bf16.msra.mxu0 %v3918_v57  ;;  %v713_v57 = vld [vmem:[%s4733_s14 + $0x718] sm:$0xff] }
  0xf3   : > { %2343 = vmatpush1.bf16.msra.mxu1 %v4046_v61  ;;  %2303 = vmatprep.subr.bf16.mxu0 %v3911_v13  ;;  %v717_v61 = vld [vmem:[%s4733_s14 + $0x738] sm:$0xff]  ;;  %v3982_v13 = vcombine.low %v593_v9, %v597_v15  ;;  %v2392_v15 = vlaneseq }
  0xf4   : > { %2344 = vmatprep.subr.bf16.mxu1 %v4039_v23  ;;  %v4110_v23 = vcombine.low %v721_v16, %v725_v17  ;;  %v4103_v25 = vcombine.high %v713_v57, %v717_v61  ;;  %v581_v0 = vld [vmem:[%s4733_s14 + $0x2f8] sm:$0xff] }
  0xf5   : > { %v3967_v27 = vcombine.high %v577_v26, %v581_v0  ;;  %v573_v30 = vld [vmem:[%s4733_s14 + $0x2b8] sm:$0xff]  ;;  %v5117_v17 = vshrl.u32 %v2392_v15, 7 }
  0xf6   : > { %2304 = vmatpush1.bf16.msra.mxu0 %v3910_v62  ;;  %v705_v62 = vld [vmem:[%s4733_s14 + $0x6d8] sm:$0xff]  ;;  %v3959_v35 = vcombine.high %v569_v29, %v573_v30 }
  0xf7   : > { %2345 = vmatpush1.bf16.msra.mxu1 %v4038_v4  ;;  %2305 = vmatprep.subr.bf16.mxu0 %v3903_v63  ;;  %v709_v4 = vld [vmem:[%s4733_s14 + $0x6f8] sm:$0xff]  ;;  %v3974_v63 = vcombine.low %v585_v21, %v589_v22 }
  0xf8   : > { %2346 = vmatprep.subr.bf16.mxu1 %v4031_v14  ;;  %v4102_v14 = vcombine.low %v713_v57, %v717_v61  ;;  %v4095_v28 = vcombine.high %v705_v62, %v709_v4  ;;  %v561_v37 = vld [vmem:[%s4733_s14 + $0x258] sm:$0xff] }
  0xf9   : > { %v565_v38 = vld [vmem:[%s4733_s14 + $0x278] sm:$0xff] }
  0xfa   : > { %2306 = vmatpush1.bf16.msra.mxu0 %v3902_v31  ;;  %v697_v31 = vld [vmem:[%s4733_s14 + $0x698] sm:$0xff]  ;;  %v3951_v44 = vcombine.high %v561_v37, %v565_v38 }
  0xfb   : > { %2347 = vmatpush1.bf16.msra.mxu1 %v4030_v32  ;;  %2307 = vmatprep.subr.bf16.mxu0 %v3895_v33  ;;  %v701_v32 = vld [vmem:[%s4733_s14 + $0x6b8] sm:$0xff]  ;;  %v3966_v33 = vcombine.low %v577_v26, %v581_v0  ;;  %v476_v26 = vld [vmem:[#allocation2] sm:$0xff] }
  0xfc   : > { %2348 = vmatprep.subr.bf16.mxu1 %v4023_v34  ;;  %v4094_v34 = vcombine.low %v705_v62, %v709_v4  ;;  %v4087_v36 = vcombine.high %v697_v31, %v701_v32  ;;  %v553_v47 = vld [vmem:[%s4733_s14 + $0x218] sm:$0xff] }
  0xfd   : > { %v557_v48 = vld [vmem:[%s4733_s14 + $0x238] sm:$0xff] }
  0xfe   : > { %2308 = vmatpush1.bf16.msra.mxu0 %v3894_v39  ;;  %v689_v39 = vld [vmem:[%s4733_s14 + $0x658] sm:$0xff]  ;;  %v3943_v53 = vcombine.high %v553_v47, %v557_v48  ;;  %v3942_v58 = vcombine.low %v553_v47, %v557_v48 }
  0xff   : > { %2349 = vmatpush1.bf16.msra.mxu1 %v4022_v40  ;;  %2309 = vmatprep.subr.bf16.mxu0 %v3887_v41  ;;  %v693_v40 = vld [vmem:[%s4733_s14 + $0x678] sm:$0xff]  ;;  %v3958_v41 = vcombine.low %v569_v29, %v573_v30 }
 0x100   : > { %2350 = vmatprep.subr.bf16.mxu1 %v4015_v42  ;;  %v4086_v42 = vcombine.low %v697_v31, %v701_v32  ;;  %v4079_v45 = vcombine.high %v689_v39, %v693_v40 }
 0x102   : > { %2310 = vmatpush1.bf16.msra.mxu0 %v3886_v49  ;;  %v681_v49 = vld [vmem:[%s4733_s14 + $0x618] sm:$0xff] }
 0x103   : > { %2351 = vmatpush1.bf16.msra.mxu1 %v4014_v50  ;;  %2311 = vmatprep.subr.bf16.mxu0 %v3879_v51  ;;  %v685_v50 = vld [vmem:[%s4733_s14 + $0x638] sm:$0xff]  ;;  %v3950_v51 = vcombine.low %v561_v37, %v565_v38 }
 0x104   : > { %2352 = vmatprep.subr.bf16.mxu1 %v4007_v52  ;;  %v4078_v52 = vcombine.low %v689_v39, %v693_v40  ;;  %v4071_v54 = vcombine.high %v681_v49, %v685_v50  ;;  %v4070_v59 = vcombine.low %v681_v49, %v685_v50  ;;  %v477_v50 = vld [vmem:[#allocation2 + $0x8] sm:$0xff] }
 0x106   : > { %2312 = vmatpush1.bf16.msra.mxu0 %v3878_v60 }
 0x107   : > { %2353 = vmatpush1.bf16.msra.mxu1 %v4006_v1  ;;  %2313 = vmatprep.subr.bf16.mxu0 %v3999_v2 }
 0x108   : > { %2354 = vmatprep.subr.bf16.mxu1 %v4127_v3 }
 0x10a   : > { %2314 = vmatpush2.bf16.msra.mxu0 %v3998_v12 }
 0x10b   : > { %2355 = vmatpush2.bf16.msra.mxu1 %v4126_v55  ;;  %2315 = vmatprep.subr.bf16.mxu0 %v3991_v56 }
 0x10c   : > { %2356 = vmatprep.subr.bf16.mxu1 %v4119_v6  ;;  %v4644_v6 = vmov 1983009808  }
 0x10d   : > { %v2390_v9 = vunpack.c.l.s4 %v4644_v6 }
 0x10e   : > { %2316 = vmatpush2.bf16.msra.mxu0 %v3990_v10 }
 0x10f   : > { %2357 = vmatpush2.bf16.msra.mxu1 %v4118_v18  ;;  %2317 = vmatprep.subr.bf16.mxu0 %v3983_v19  ;;  %v2391_v16 = vunpack.c.0.s8 %v2390_v9 }
 0x110   : > { %2358 = vmatprep.subr.bf16.mxu1 %v4111_v20 }
 0x111   : > { %v5120_v20 = vsub.s32 %v2391_v16, %v5117_v17 }
 0x112   : > { %2318 = vmatpush2.bf16.msra.mxu0 %v3982_v13 }
 0x113   : > { %2359 = vmatpush2.bf16.msra.mxu1 %v4110_v23  ;;  %2319 = vmatprep.subr.bf16.mxu0 %v3975_v24 }
 0x114   : > { %2360 = vmatprep.subr.bf16.mxu1 %v4103_v25 }
 0x116   : > { %2320 = vmatpush2.bf16.msra.mxu0 %v3974_v63 }
 0x117   : > { %2361 = vmatpush2.bf16.msra.mxu1 %v4102_v14  ;;  %2321 = vmatprep.subr.bf16.mxu0 %v3967_v27 }
 0x118   : > { %2362 = vmatprep.subr.bf16.mxu1 %v4095_v28 }
 0x11a   : > { %2322 = vmatpush2.bf16.msra.mxu0 %v3966_v33 }
 0x11b   : > { %2363 = vmatpush2.bf16.msra.mxu1 %v4094_v34  ;;  %2323 = vmatprep.subr.bf16.mxu0 %v3959_v35 }
 0x11c   : > { %2364 = vmatprep.subr.bf16.mxu1 %v4087_v36 }
 0x11e   : > { %2324 = vmatpush2.bf16.msra.mxu0 %v3958_v41 }
 0x11f   : > { %2365 = vmatpush2.bf16.msra.mxu1 %v4086_v42  ;;  %2325 = vmatprep.subr.bf16.mxu0 %v3951_v44 }
 0x120   : > { %2366 = vmatprep.subr.bf16.mxu1 %v4079_v45 }
 0x122   : > { %2326 = vmatpush2.bf16.msra.mxu0 %v3950_v51 }
 0x123   : > { %2367 = vmatpush2.bf16.msra.mxu1 %v4078_v52  ;;  %2327 = vmatprep.subr.bf16.mxu0 %v3943_v53 }
 0x124   : > { %2368 = vmatprep.subr.bf16.mxu1 %v4071_v54 }
 0x126   : > { %2328 = vmatpush2.bf16.msra.mxu0 %v3942_v58 }
 0x127   : > { %2369 = vmatpush2.bf16.msra.mxu1 %v4070_v59 }
 0x129   : > { %v2085_v60 = vpop.f32.mrf.mxu0  ;;  %2330 = vmatmul.mubr.bf16.vlgmr.msra.gmra.mxu0 %v4913_v43 }
 0x12a   : > { %v2126_v1 = vpop.f32.mrf.mxu1  ;;  %2371 = vmatmul.mubr.bf16.vlgmr.msra.gmra.mxu1 %v4917_v46 }
 0x12b   : > { %v2127_v2 = vadd.f32 %v2126_v1, %v2085_v60  ;;  %v2087_v3 = vpop.f32.mrf.mxu0 }
 0x12c   : > { %v2128_v5 = vpop.f32.mrf.mxu1 }
 0x12d   : > { %v2129_v7 = vadd.f32 %v2128_v5, %v2087_v3  ;;  %v2089_v8 = vpop.f32.mrf.mxu0 }
 0x12e   : > { %v2130_v11 = vpop.f32.mrf.mxu1 }
 0x12f   : > { %v2387_v12 = vcombine.low %v2127_v2, %v2129_v7  ;;  %v2090_v55 = vpop.f32.mrf.mxu0 }
 0x130   : > { %v2131_v56 = vpop.f32.mrf.mxu1 }
 0x131   : > { %v2395_v24 = vrot.slane %v2387_v12, %v5120_v20 }
 0x169   : > { %v2167_v10 = vpop.f32.mrf.mxu0 }
 0x16a   : > { %v2208_v43 = vpop.f32.mrf.mxu1 }
 0x16b   : > { %v2209_v18 = vadd.f32 %v2208_v43, %v2167_v10  ;;  %v2169_v19 = vpop.f32.mrf.mxu0 }
 0x16c   : > { %v2210_v46 = vpop.f32.mrf.mxu1 }
 0x16d   : > { %v2211_v21 = vadd.f32 %v2210_v46, %v2169_v19  ;;  %v2171_v22 = vpop.f32.mrf.mxu0 }
 0x16e   : > { %v2212_v57 = vpop.f32.mrf.mxu1 }
 0x16f   : > { %v2388_v61 = vcombine.low %v2209_v18, %v2211_v21  ;;  %v2172_v13 = vpop.f32.mrf.mxu0 }
 0x170   : > { %v2213_v23 = vpop.f32.mrf.mxu1 }
 0x171   : > { %v2402_v25 = vrot.slane %v2388_v61, %v5120_v20 }
 0x173   : > { %v2403_v0 = vcombine.low %v2395_v24, %v2402_v25 }
 0x175   : > { %v2423_v62 = vadd.f32 %v2403_v0, %v476_v26 }
 0x177   : > { %2425 = vst [vmem:[#allocation2] sm:$0xff] %v2423_v62 }
 0x1a9   : > { %v2249_v4 = vpop.f32.mrf.mxu0 }
 0x1aa   : > { %v2290_v63 = vpop.f32.mrf.mxu1 }
 0x1ab   : > { %v2291_v14 = vadd.f32 %v2290_v63, %v2249_v4  ;;  %v2251_v27 = vpop.f32.mrf.mxu0 }
 0x1ac   : > { %v2292_v28 = vpop.f32.mrf.mxu1 }
 0x1ad   : > { %v2293_v29 = vadd.f32 %v2292_v28, %v2251_v27  ;;  %v2253_v30 = vpop.f32.mrf.mxu0 }
 0x1ae   : > { %v2294_v31 = vpop.f32.mrf.mxu1 }
 0x1af   : > { %v2404_v32 = vcombine.low %v2291_v14, %v2293_v29  ;;  %v2254_v33 = vpop.f32.mrf.mxu0 }
 0x1b0   : > { %v2295_v34 = vpop.f32.mrf.mxu1 }
 0x1b1   : > { %v2412_v48 = vrot.slane %v2404_v32, %v5120_v20 }
 0x1e9   : > { %v2331_v35 = vpop.f32.mrf.mxu0 }
 0x1ea   : > { %v2372_v36 = vpop.f32.mrf.mxu1 }
 0x1eb   : > { %v2333_v37 = vpop.f32.mrf.mxu0  ;;  %v2373_v39 = vadd.f32 %v2372_v36, %v2331_v35 }
 0x1ec   : > { %v2374_v38 = vpop.f32.mrf.mxu1 }
 0x1ed   : > { %v2375_v40 = vadd.f32 %v2374_v38, %v2333_v37  ;;  %v2335_v41 = vpop.f32.mrf.mxu0 }
 0x1ee   : > { %v2376_v42 = vpop.f32.mrf.mxu1 }
 0x1ef   : > { %v2405_v44 = vcombine.low %v2373_v39, %v2375_v40  ;;  %v2336_v45 = vpop.f32.mrf.mxu0 }
 0x1f0   : > { %v2377_v47 = vpop.f32.mrf.mxu1 }
 0x1f1   : > { %v2419_v49 = vrot.slane %v2405_v44, %v5120_v20 }
 0x1f3   : > { %v2420_v51 = vcombine.low %v2412_v48, %v2419_v49  ;;  %2430 = sbr.rel (%p4128_p10) target bundleno = 1239 (0x4d7), region = 102 }
 0x1f5   : > { %v2424_v52 = vadd.f32 %v2420_v51, %v477_v50 }
 0x1f7   : > { %2426 = vst [vmem:[#allocation2 + $0x8] sm:$0xff] %v2424_v52 }
 0x1f8   : > { %v4375_v53 = vld [vmem:[%s5666_s3 + $0x74] ss:$8 sps:$4 sm:$0xff]   ;;  %v4379_v58 = vld [vmem:[%s5666_s3 + $0x70] ss:$8 sps:$4 sm:$0xff]   ;;  %v4381_v60 = vld [vmem:[%s5666_s3 + $0x64] ss:$8 sps:$4 sm:$0xff]  }
 0x1f9   : > { %v4377_v54 = vld [vmem:[%s5666_s3 + $0x174] ss:$8 sps:$4 sm:$0xff]   ;;  %3339 = vmatprep.subr.bf16.mxu0 %v4375_v53  ;;  %v4380_v59 = vld [vmem:[%s5666_s3 + $0x170] ss:$8 sps:$4 sm:$0xff]   ;;  %v4383_v1 = vld [vmem:[%s5666_s3 + $0x164] ss:$8 sps:$4 sm:$0xff]  }
 0x1fa   : > { %3380 = vmatprep.subr.bf16.mxu1 %v4377_v54  ;;  %3340 = vmatpush1.bf16.msra.mxu0 %v4379_v58  ;;  %v4385_v2 = vld [vmem:[%s5666_s3 + $0x60] ss:$8 sps:$4 sm:$0xff]   ;;  %v4387_v5 = vld [vmem:[%s5666_s3 + $0x54] ss:$8 sps:$4 sm:$0xff]   ;;  %v4391_v8 = vld [vmem:[%s5666_s3 + $0x50] ss:$8 sps:$4 sm:$0xff]  }
 0x1fb   : > { %3381 = vmatpush1.bf16.msra.mxu1 %v4380_v59  ;;  %3341 = vmatprep.subr.bf16.mxu0 %v4381_v60  ;;  %v4386_v3 = vld [vmem:[%s5666_s3 + $0x160] ss:$8 sps:$4 sm:$0xff]   ;;  %v4389_v7 = vld [vmem:[%s5666_s3 + $0x154] ss:$8 sps:$4 sm:$0xff]   ;;  %v4392_v11 = vld [vmem:[%s5666_s3 + $0x150] ss:$8 sps:$4 sm:$0xff]  }
 0x1fc   : > { %3382 = vmatprep.subr.bf16.mxu1 %v4383_v1  ;;  %v4393_v12 = vld [vmem:[%s5666_s3 + $0x44] ss:$8 sps:$4 sm:$0xff]   ;;  %v4397_v56 = vld [vmem:[%s5666_s3 + $0x40] ss:$8 sps:$4 sm:$0xff]   ;;  %v4399_v9 = vld [vmem:[%s5666_s3 + $0x34] ss:$8 sps:$4 sm:$0xff]  }
 0x1fd   : > { %v4395_v55 = vld [vmem:[%s5666_s3 + $0x144] ss:$8 sps:$4 sm:$0xff]   ;;  %v4398_v6 = vld [vmem:[%s5666_s3 + $0x140] ss:$8 sps:$4 sm:$0xff]   ;;  %v4401_v15 = vld [vmem:[%s5666_s3 + $0x134] ss:$8 sps:$4 sm:$0xff]  }
 0x1fe   : > { %3342 = vmatpush1.bf16.msra.mxu0 %v4385_v2  ;;  %v4403_v16 = vld [vmem:[%s5666_s3 + $0x30] ss:$8 sps:$4 sm:$0xff]   ;;  %v4405_v43 = vld [vmem:[%s5666_s3 + $0x24] ss:$8 sps:$4 sm:$0xff]   ;;  %v4409_v19 = vld [vmem:[%s5666_s3 + $0x20] ss:$8 sps:$4 sm:$0xff]  }
 0x1ff   : > { %3383 = vmatpush1.bf16.msra.mxu1 %v4386_v3  ;;  %3343 = vmatprep.subr.bf16.mxu0 %v4387_v5  ;;  %v4404_v10 = vld [vmem:[%s5666_s3 + $0x130] ss:$8 sps:$4 sm:$0xff]   ;;  %v4407_v18 = vld [vmem:[%s5666_s3 + $0x124] ss:$8 sps:$4 sm:$0xff]   ;;  %v4410_v46 = vld [vmem:[%s5666_s3 + $0x120] ss:$8 sps:$4 sm:$0xff]  }
 0x200   : > { %3384 = vmatprep.subr.bf16.mxu1 %v4389_v7  ;;  %v4411_v21 = vld [vmem:[%s5666_s3 + $0x14] ss:$8 sps:$4 sm:$0xff]   ;;  %v4415_v57 = vld [vmem:[%s5666_s3 + $0x10] ss:$8 sps:$4 sm:$0xff]   ;;  %v4417_v13 = vld [vmem:[%s5666_s3 + $0x4] ss:$8 sps:$4 sm:$0xff]  }
 0x201   : > { %v4413_v22 = vld [vmem:[%s5666_s3 + $0x114] ss:$8 sps:$4 sm:$0xff]   ;;  %v4416_v61 = vld [vmem:[%s5666_s3 + $0x110] ss:$8 sps:$4 sm:$0xff]   ;;  %v4419_v23 = vld [vmem:[%s5666_s3 + $0x104] ss:$8 sps:$4 sm:$0xff]  }
 0x202   : > { %3344 = vmatpush1.bf16.msra.mxu0 %v4391_v8  ;;  %v4421_v24 = vld [vmem:[%s5666_s3] ss:$8 sps:$4 sm:$0xff]   ;;  %v4423_v26 = vld [vmem:[%s5666_s3 + $0xf4] ss:$8 sps:$4 sm:$0xff]   ;;  %v4427_v62 = vld [vmem:[%s5666_s3 + $0xf0] ss:$8 sps:$4 sm:$0xff]  }
 0x203   : > { %3385 = vmatpush1.bf16.msra.mxu1 %v4392_v11  ;;  %3345 = vmatprep.subr.bf16.mxu0 %v4393_v12  ;;  %v4422_v25 = vld [vmem:[%s5666_s3 + $0x100] ss:$8 sps:$4 sm:$0xff]   ;;  %v4425_v0 = vld [vmem:[%s5666_s3 + $0x1f4] ss:$8 sps:$4 sm:$0xff]   ;;  %v4428_v4 = vld [vmem:[%s5666_s3 + $0x1f0] ss:$8 sps:$4 sm:$0xff]  }
 0x204   : > { %3386 = vmatprep.subr.bf16.mxu1 %v4395_v55  ;;  %v4429_v63 = vld [vmem:[%s5666_s3 + $0xe4] ss:$8 sps:$4 sm:$0xff]   ;;  %v4433_v27 = vld [vmem:[%s5666_s3 + $0xe0] ss:$8 sps:$4 sm:$0xff]   ;;  %v4435_v29 = vld [vmem:[%s5666_s3 + $0xd4] ss:$8 sps:$4 sm:$0xff]  }
 0x205   : > { %v4431_v14 = vld [vmem:[%s5666_s3 + $0x1e4] ss:$8 sps:$4 sm:$0xff]   ;;  %v4434_v28 = vld [vmem:[%s5666_s3 + $0x1e0] ss:$8 sps:$4 sm:$0xff]   ;;  %v4437_v30 = vld [vmem:[%s5666_s3 + $0x1d4] ss:$8 sps:$4 sm:$0xff]  }
 0x206   : > { %3346 = vmatpush1.bf16.msra.mxu0 %v4397_v56  ;;  %v4439_v31 = vld [vmem:[%s5666_s3 + $0xd0] ss:$8 sps:$4 sm:$0xff]   ;;  %v2437_v33 = vsub.s32 0, %v5117_v17  ;;  %v4441_v34 = vld [vmem:[%s5666_s3 + $0xc4] ss:$8 sps:$4 sm:$0xff]   ;;  %v2441_v35 = vsub.s32 1, %v5117_v17 }
 0x207   : > { %3387 = vmatpush1.bf16.msra.mxu1 %v4398_v6  ;;  %3347 = vmatprep.subr.bf16.mxu0 %v4399_v9  ;;  %v4440_v32 = vld [vmem:[%s5666_s3 + $0x1d0] ss:$8 sps:$4 sm:$0xff]   ;;  %v2445_v36 = vsub.s32 2, %v5117_v17  ;;  %v4443_v37 = vld [vmem:[%s5666_s3 + $0x1c4] ss:$8 sps:$4 sm:$0xff]   ;;  %v2449_v38 = vsub.s32 3, %v5117_v17 }
 0x208   : > { %3388 = vmatprep.subr.bf16.mxu1 %v4401_v15  ;;  %v5272_v39 = vld [vmem:[%s5665_s2] sm:$0xff]  ;;  %v4447_v47 = vld [vmem:[%s5666_s3 + $0xb4] ss:$8 sps:$4 sm:$0xff]   ;;  %v4451_v52 = vld [vmem:[%s5666_s3 + $0xb0] ss:$8 sps:$4 sm:$0xff]   ;;  %vm4646_vm2 = vmmov 0  }
 0x209   : > { %v4445_v40 = vld [vmem:[%s5666_s3 + $0xc0] ss:$8 sps:$4 sm:$0xff]   ;;  %v2438_v42 = vrot.slane %v5272_v39, %v2437_v33  ;;  %v2442_v44 = vrot.slane %v5272_v39, %v2441_v35  ;;  %v2446_v45 = vrot.slane %v5272_v39, %v2445_v36  ;;  %v4449_v48 = vld [vmem:[%s5666_s3 + $0x1b4] ss:$8 sps:$4 sm:$0xff]   ;;  %v2450_v49 = vrot.slane %v5272_v39, %v2449_v38  ;;  %v4452_v53 = vld [vmem:[%s5666_s3 + $0x1b0] ss:$8 sps:$4 sm:$0xff]  }
 0x20a   : > { %3348 = vmatpush1.bf16.msra.mxu0 %v4403_v16  ;;  %v4446_v41 = vld [vmem:[%s5666_s3 + $0x1c0] ss:$8 sps:$4 sm:$0xff]   ;;  %v4453_v58 = vld [vmem:[%s5666_s3 + $0xa4] ss:$8 sps:$4 sm:$0xff]   ;;  %v4459_v7 = vld [vmem:[%s5666_s3 + $0x94] ss:$8 sps:$4 sm:$0xff]  }
 0x20b   : > { %3389 = vmatpush1.bf16.msra.mxu1 %v4404_v10  ;;  %3349 = vmatprep.subr.bf16.mxu0 %v4405_v43  ;;  %v2467_v50 = vcombine.low %v2438_v42, %v2442_v44  ;;  %v2468_v51 = vcombine.low %v2446_v45, %v2450_v49  ;;  %v4455_v59 = vld [vmem:[%s5666_s3 + $0x1a4] ss:$8 sps:$4 sm:$0xff]   ;;  %v4457_v3 = vld [vmem:[%s5666_s3 + $0xa0] ss:$8 sps:$4 sm:$0xff]   ;;  %v4461_v8 = vld [vmem:[%s5666_s3 + $0x194] ss:$8 sps:$4 sm:$0xff]  }
 0x20c   : > { %3390 = vmatprep.subr.bf16.mxu1 %v4407_v18  ;;  %v2431_v1 = vld [vmem:[#allocation2] sm:$0xff]  ;;  %v4463_v55 = vld [vmem:[%s5666_s3 + $0x90] ss:$8 sps:$4 sm:$0xff]  }
 0x20d   : > { %v2475_v54 = vrot.slane %v2467_v50, %v5120_v20  ;;  %v2482_v60 = vrot.slane %v2468_v51, %v5120_v20  ;;  %v4458_v5 = vld [vmem:[%s5666_s3 + $0x1a0] ss:$8 sps:$4 sm:$0xff]   ;;  %v4464_v56 = vld [vmem:[%s5666_s3 + $0x190] ss:$8 sps:$4 sm:$0xff]   ;;  %v4465_v6 = vld [vmem:[%s5666_s3 + $0x84] ss:$8 sps:$4 sm:$0xff]  }
 0x20e   : > { %3350 = vmatpush1.bf16.msra.mxu0 %v4409_v19  ;;  %v4467_v9 = vld [vmem:[%s5666_s3 + $0x184] ss:$8 sps:$4 sm:$0xff]   ;;  %v4469_v18 = vld [vmem:[%s5666_s3 + $0x80] ss:$8 sps:$4 sm:$0xff]   ;;  %v4486_v38 = vld [vmem:[%s5666_s3 + $0x350] ss:$8 sps:$4 sm:$0xff]  }
 0x20f   : > { %3391 = vmatpush1.bf16.msra.mxu1 %v4410_v46  ;;  %3351 = vmatprep.subr.bf16.mxu0 %v4411_v21  ;;  %v2483_v2 = vcombine.low %v2475_v54, %v2482_v60  ;;  %v4470_v19 = vld [vmem:[%s5666_s3 + $0x180] ss:$8 sps:$4 sm:$0xff]   ;;  %v4495_v51 = vld [vmem:[%s5666_s3 + $0x230] ss:$8 sps:$4 sm:$0xff]   ;;  %v4506_v54 = vld [vmem:[%s5666_s3 + $0x324] ss:$8 sps:$4 sm:$0xff]  }
 0x210   : > { %3392 = vmatprep.subr.bf16.mxu1 %v4413_v22  ;;  %v4473_v22 = vld [vmem:[%s5666_s3 + $0x274] ss:$8 sps:$4 sm:$0xff]   ;;  %v4489_v44 = vld [vmem:[%s5666_s3 + $0x240] ss:$8 sps:$4 sm:$0xff]  }
 0x211   : > { %v2503_v11 = vadd.f32 %v2483_v2, %v2431_v1  ;;  %v4492_v45 = vld [vmem:[%s5666_s3 + $0x340] ss:$8 sps:$4 sm:$0xff]   ;;  %v4509_v1 = vld [vmem:[%s5666_s3 + $0x214] ss:$8 sps:$4 sm:$0xff]  }
 0x212   : > { %3352 = vmatpush1.bf16.msra.mxu0 %v4415_v57  ;;  %v4476_v57 = vld [vmem:[%s5666_s3 + $0x374] ss:$8 sps:$4 sm:$0xff]   ;;  %v4504_v60 = vld [vmem:[%s5666_s3 + $0x320] ss:$8 sps:$4 sm:$0xff]  }
 0x213   : > { %3393 = vmatpush1.bf16.msra.mxu1 %v4416_v61  ;;  %3353 = vmatprep.subr.bf16.mxu0 %v4417_v13  ;;  %v2505_v12 = vmax.f32 %v2503_v11, 0.0  ;;  %v4512_v2 = vld [vmem:[%s5666_s3 + $0x314] ss:$8 sps:$4 sm:$0xff]   ;;  %v4518_v11 = vld [vmem:[%s5666_s3 + $0x304] ss:$8 sps:$4 sm:$0xff]  }
 0x214   : > { %3394 = vmatprep.subr.bf16.mxu1 %v4419_v23 }
 0x215   : > { %v2516_v15 = vrot.slane %v2505_v12, %v5120_v20  ;;  %v2509_v16 = vcombine.high %v2505_v12, %v2505_v12 }
 0x216   : > { %3354 = vmatpush1.bf16.msra.mxu0 %v4421_v24  ;;  %v4471_v24 = vld [vmem:[%s5666_s3 + $0x270] ss:$8 sps:$4 sm:$0xff]  }
 0x217   : > { %3395 = vmatpush1.bf16.msra.mxu1 %v4422_v25  ;;  %3355 = vmatprep.subr.bf16.mxu0 %v4423_v26  ;;  %v2524_v10 = vcombine.high %v2516_v15, %v2516_v15  ;;  %v2523_v43 = vrot.slane %v2509_v16, %v5120_v20  ;;  %v2551_v13 = vpack.c.bf16 %v2516_v15, %v2516_v15  ;;  %v4474_v25 = vld [vmem:[%s5666_s3 + $0x370] ss:$8 sps:$4 sm:$0xff]   ;;  %v4479_v26 = vld [vmem:[%s5666_s3 + $0x264] ss:$8 sps:$4 sm:$0xff]   ;;  %v4524_v15 = vld [vmem:[%s5666_s3 + $0x3f4] ss:$8 sps:$4 sm:$0xff]  }
 0x218   : > { %3396 = vmatprep.subr.bf16.mxu1 %v4425_v0  ;;  %v4482_v0 = vld [vmem:[%s5666_s3 + $0x364] ss:$8 sps:$4 sm:$0xff]  }
 0x219   : > { %v2552_v46 = vpack.c.bf16 %v2524_v10, %v2524_v10  ;;  %v2525_v21 = vcombine.high %v2523_v43, %v2523_v43  ;;  %v2553_v23 = vpack.c.bf16 %v2523_v43, %v2523_v43 }
 0x21a   : > { %3356 = vmatpush2.bf16.msra.mxu0 %v4427_v62  ;;  %v2453_v62 = vsub.s32 4, %v5117_v17 }
 0x21b   : > { %3397 = vmatpush2.bf16.msra.mxu1 %v4428_v4  ;;  %3357 = vmatprep.subr.bf16.mxu0 %v4429_v63  ;;  %v2554_v61 = vpack.c.bf16 %v2525_v21, %v2525_v21  ;;  %v2457_v4 = vsub.s32 5, %v5117_v17  ;;  %v2461_v63 = vsub.s32 6, %v5117_v17  ;;  %v4527_v21 = vld [vmem:[%s5666_s3 + $0x2e4] ss:$8 sps:$4 sm:$0xff]  }
 0x21c   : > { %3398 = vmatprep.subr.bf16.mxu1 %v4431_v14  ;;  %3371 = vmatprep.mubr.bf16.mxu0 %v2552_v46  ;;  %v2465_v14 = vsub.s32 7, %v5117_v17  ;;  %v4522_v46 = vld [vmem:[%s5666_s3 + $0x3f0] ss:$8 sps:$4 sm:$0xff]  }
 0x21d   : > { %3412 = vmatprep.mubr.bf16.mxu1 %v2554_v61  ;;  %v4588_v17 = vld [vmem:[%s5670_s7 + $0x10] sm:$0xff]  }
 0x21e   : > { %3358 = vmatpush2.bf16.msra.mxu0 %v4433_v27  ;;  %v4477_v27 = vld [vmem:[%s5666_s3 + $0x260] ss:$8 sps:$4 sm:$0xff]   ;;  %v2466_v36 = vrot.slane %v5272_v39, %v2465_v14 }
 0x21f   : > { %3399 = vmatpush2.bf16.msra.mxu1 %v4434_v28  ;;  %3359 = vmatprep.subr.bf16.mxu0 %v4435_v29  ;;  %v4480_v28 = vld [vmem:[%s5666_s3 + $0x360] ss:$8 sps:$4 sm:$0xff]   ;;  %v4485_v29 = vld [vmem:[%s5666_s3 + $0x254] ss:$8 sps:$4 sm:$0xff]  }
 0x220   : > { %3400 = vmatprep.subr.bf16.mxu1 %v4437_v30  ;;  %v4488_v30 = vld [vmem:[%s5666_s3 + $0x354] ss:$8 sps:$4 sm:$0xff]   ;;  %v4540_v14 = vld [vmem:[%s5666_s3 + $0x3c0] ss:$8 sps:$4 sm:$0xff]  }
 0x222   : > { %3360 = vmatpush2.bf16.msra.mxu0 %v4439_v31  ;;  %v2454_v31 = vrot.slane %v5272_v39, %v2453_v62  ;;  %v4539_v62 = vld [vmem:[%s5666_s3 + $0x2c4] ss:$8 sps:$4 sm:$0xff]  }
 0x223   : > { %3401 = vmatpush2.bf16.msra.mxu1 %v4440_v32  ;;  %3361 = vmatprep.subr.bf16.mxu0 %v4441_v34  ;;  %v2458_v32 = vrot.slane %v5272_v39, %v2457_v4  ;;  %v2462_v34 = vrot.slane %v5272_v39, %v2461_v63  ;;  %v4494_v39 = vld [vmem:[%s5666_s3 + $0x344] ss:$8 sps:$4 sm:$0xff]   ;;  %v4537_v63 = vld [vmem:[%s5666_s3 + $0x2c0] ss:$8 sps:$4 sm:$0xff]  }
 0x224   : > { %3402 = vmatprep.subr.bf16.mxu1 %v4443_v37  ;;  %v4483_v37 = vld [vmem:[%s5666_s3 + $0x250] ss:$8 sps:$4 sm:$0xff]   ;;  %v4542_v4 = vld [vmem:[%s5666_s3 + $0x3c4] ss:$8 sps:$4 sm:$0xff]  }
 0x225   : > { %v2485_v42 = vcombine.low %v2462_v34, %v2466_v36  ;;  %v4549_v34 = vld [vmem:[%s5666_s3 + $0x2a0] ss:$8 sps:$4 sm:$0xff]  }
 0x226   : > { %3362 = vmatpush2.bf16.msra.mxu0 %v4445_v40  ;;  %v4491_v40 = vld [vmem:[%s5666_s3 + $0x244] ss:$8 sps:$4 sm:$0xff]   ;;  %v4552_v36 = vld [vmem:[%s5666_s3 + $0x3a0] ss:$8 sps:$4 sm:$0xff]  }
 0x227   : > { %3403 = vmatpush2.bf16.msra.mxu1 %v4446_v41  ;;  %3363 = vmatprep.subr.bf16.mxu0 %v4447_v47  ;;  %v2484_v41 = vcombine.low %v2454_v31, %v2458_v32  ;;  %v4497_v47 = vld [vmem:[%s5666_s3 + $0x234] ss:$8 sps:$4 sm:$0xff]   ;;  %v2499_v50 = vrot.slane %v2485_v42, %v5120_v20  ;;  %v4551_v31 = vld [vmem:[%s5666_s3 + $0x2a4] ss:$8 sps:$4 sm:$0xff]  }
 0x228   : > { %3404 = vmatprep.subr.bf16.mxu1 %v4449_v48  ;;  %v4500_v48 = vld [vmem:[%s5666_s3 + $0x334] ss:$8 sps:$4 sm:$0xff]   ;;  %v4554_v32 = vld [vmem:[%s5666_s3 + $0x3a4] ss:$8 sps:$4 sm:$0xff]  }
 0x229   : > { %v2492_v49 = vrot.slane %v2484_v41, %v5120_v20  ;;  %v4563_v41 = vld [vmem:[%s5666_s3 + $0x284] ss:$8 sps:$4 sm:$0xff]  }
 0x22a   : > { %3364 = vmatpush2.bf16.msra.mxu0 %v4451_v52  ;;  %v4498_v52 = vld [vmem:[%s5666_s3 + $0x330] ss:$8 sps:$4 sm:$0xff]   ;;  %v4566_v42 = vld [vmem:[%s5666_s3 + $0x384] ss:$8 sps:$4 sm:$0xff]  }
 0x22b   : > { %3405 = vmatpush2.bf16.msra.mxu1 %v4452_v53  ;;  %3365 = vmatprep.subr.bf16.mxu0 %v4453_v58  ;;  %v4503_v53 = vld [vmem:[%s5666_s3 + $0x224] ss:$8 sps:$4 sm:$0xff]   ;;  %v2500_v58 = vcombine.low %v2492_v49, %v2499_v50  ;;  %v4567_v49 = vld [vmem:[%s5668_s5 + $0x78] sm:$0xff]  }
 0x22c   : > { %3406 = vmatprep.subr.bf16.mxu1 %v4455_v59  ;;  %v4501_v59 = vld [vmem:[%s5666_s3 + $0x220] ss:$8 sps:$4 sm:$0xff]   ;;  %v4568_v50 = vld [vmem:[%s5668_s5 + $0x38] sm:$0xff]  }
 0x22e   : > { %3366 = vmatpush2.bf16.msra.mxu0 %v4457_v3  ;;  %v4507_v3 = vld [vmem:[%s5666_s3 + $0x210] ss:$8 sps:$4 sm:$0xff]  }
 0x22f   : > { %3407 = vmatpush2.bf16.msra.mxu1 %v4458_v5  ;;  %3367 = vmatprep.subr.bf16.mxu0 %v4459_v7  ;;  %v4510_v5 = vld [vmem:[%s5666_s3 + $0x310] ss:$8 sps:$4 sm:$0xff]   ;;  %v2432_v7 = vld [vmem:[#allocation2 + $0x8] sm:$0xff] }
 0x230   : > { %3408 = vmatprep.subr.bf16.mxu1 %v4461_v8  ;;  %v4515_v8 = vld [vmem:[%s5666_s3 + $0x204] ss:$8 sps:$4 sm:$0xff]   ;;  %v2504_v12 = vadd.f32 %v2500_v58, %v2432_v7 }
 0x231   : > { %v4573_v58 = vld [vmem:[%s5668_s5 + $0x60] sm:$0xff]   ;;  %v4580_v7 = vld [vmem:[%s5668_s5 + $0x8] sm:$0xff]  }
 0x232   : > { %3368 = vmatpush2.bf16.msra.mxu0 %v4463_v55  ;;  %v2506_v55 = vmax.f32 %v2504_v12, 0.0  ;;  %v4583_v12 = vld [vmem:[%s5670_s7 + $0x38] sm:$0xff]  }
 0x233   : > { %3409 = vmatpush2.bf16.msra.mxu1 %v4464_v56  ;;  %3369 = vmatprep.subr.bf16.mxu0 %v4465_v6  ;;  %v4513_v56 = vld [vmem:[%s5666_s3 + $0x200] ss:$8 sps:$4 sm:$0xff]  }
 0x234   : > { %3410 = vmatprep.subr.bf16.mxu1 %v4467_v9  ;;  %v4516_v6 = vld [vmem:[%s5666_s3 + $0x300] ss:$8 sps:$4 sm:$0xff]   ;;  %v4521_v9 = vld [vmem:[%s5666_s3 + $0x2f4] ss:$8 sps:$4 sm:$0xff]   ;;  %v5453_v16 = vrot.slane %v2506_v55, %v5120_v20  ;;  %v2526_v10 = vcombine.high %v2506_v55, %v2506_v55  ;;  %v4645_v55 = vmov 0.0  }
 0x236   : > { %3370 = vmatpush2.bf16.msra.mxu0 %v4469_v18  ;;  %v2541_v43 = vcombine.high %v5453_v16, %v5453_v16  ;;  %v5458_v18 = vrot.slane %v2526_v10, %v5120_v20 }
 0x237   : > { %3411 = vmatpush2.bf16.msra.mxu1 %v4470_v19  ;;  %3421 = vmatprep.subr.bf16.mxu0 %v4473_v22  ;;  %v4519_v19 = vld [vmem:[%s5666_s3 + $0x2f0] ss:$8 sps:$4 sm:$0xff]   ;;  %v4530_v22 = vld [vmem:[%s5666_s3 + $0x3e4] ss:$8 sps:$4 sm:$0xff]  }
 0x238   : > { %3462 = vmatprep.subr.bf16.mxu1 %v4476_v57  ;;  %v2556_v57 = vpack.c.bf16 %v2541_v43, %v2541_v43  ;;  %v2542_v20 = vcombine.high %v5458_v18, %v5458_v18 }
 0x239   : > { %3372 = vmatmul.mubr.bf16.vlgmr.msra.gmra.mxu0 %v2551_v13  ;;  %v4525_v13 = vld [vmem:[%s5666_s3 + $0x2e0] ss:$8 sps:$4 sm:$0xff]  }
 0x23a   : > { %3413 = vmatmul.mubr.bf16.vlgmr.msra.gmra.mxu1 %v2553_v23  ;;  %3422 = vmatpush1.bf16.msra.mxu0 %v4471_v24  ;;  %v2558_v61 = vpack.c.bf16 %v2542_v20, %v2542_v20  ;;  %v4528_v23 = vld [vmem:[%s5666_s3 + $0x3e0] ss:$8 sps:$4 sm:$0xff]   ;;  %v4533_v24 = vld [vmem:[%s5666_s3 + $0x2d4] ss:$8 sps:$4 sm:$0xff]  }
 0x23b   : > { %3463 = vmatpush1.bf16.msra.mxu1 %v4474_v25  ;;  %3423 = vmatprep.subr.bf16.mxu0 %v4479_v26  ;;  %v4536_v25 = vld [vmem:[%s5666_s3 + $0x3d4] ss:$8 sps:$4 sm:$0xff]   ;;  %v4531_v26 = vld [vmem:[%s5666_s3 + $0x2d0] ss:$8 sps:$4 sm:$0xff]  }
 0x23c   : > { %3464 = vmatprep.subr.bf16.mxu1 %v4482_v0  ;;  %3453 = vmatprep.mubr.bf16.mxu0 %v2556_v57  ;;  %v4534_v0 = vld [vmem:[%s5666_s3 + $0x3d0] ss:$8 sps:$4 sm:$0xff]  }
 0x23d   : > { %3494 = vmatprep.mubr.bf16.mxu1 %v2558_v61 }
 0x23e   : > { %3424 = vmatpush1.bf16.msra.mxu0 %v4477_v27  ;;  %v4545_v27 = vld [vmem:[%s5666_s3 + $0x2b4] ss:$8 sps:$4 sm:$0xff]  }
 0x23f   : > { %3465 = vmatpush1.bf16.msra.mxu1 %v4480_v28  ;;  %3425 = vmatprep.subr.bf16.mxu0 %v4485_v29  ;;  %v4548_v28 = vld [vmem:[%s5666_s3 + $0x3b4] ss:$8 sps:$4 sm:$0xff]   ;;  %v4543_v29 = vld [vmem:[%s5666_s3 + $0x2b0] ss:$8 sps:$4 sm:$0xff]  }
 0x240   : > { %3466 = vmatprep.subr.bf16.mxu1 %v4488_v30  ;;  %v4546_v30 = vld [vmem:[%s5666_s3 + $0x3b0] ss:$8 sps:$4 sm:$0xff]  }
 0x242   : > { %3426 = vmatpush1.bf16.msra.mxu0 %v4483_v37  ;;  %v4557_v37 = vld [vmem:[%s5666_s3 + $0x294] ss:$8 sps:$4 sm:$0xff]  }
 0x243   : > { %3467 = vmatpush1.bf16.msra.mxu1 %v4486_v38  ;;  %3427 = vmatprep.subr.bf16.mxu0 %v4491_v40  ;;  %v4560_v38 = vld [vmem:[%s5666_s3 + $0x394] ss:$8 sps:$4 sm:$0xff]   ;;  %v4555_v40 = vld [vmem:[%s5666_s3 + $0x290] ss:$8 sps:$4 sm:$0xff]  }
 0x244   : > { %3468 = vmatprep.subr.bf16.mxu1 %v4494_v39  ;;  %v4558_v39 = vld [vmem:[%s5666_s3 + $0x390] ss:$8 sps:$4 sm:$0xff]  }
 0x246   : > { %3428 = vmatpush1.bf16.msra.mxu0 %v4489_v44  ;;  %v4561_v44 = vld [vmem:[%s5666_s3 + $0x280] ss:$8 sps:$4 sm:$0xff]  }
 0x247   : > { %3469 = vmatpush1.bf16.msra.mxu1 %v4492_v45  ;;  %3429 = vmatprep.subr.bf16.mxu0 %v4497_v47  ;;  %v4564_v45 = vld [vmem:[%s5666_s3 + $0x380] ss:$8 sps:$4 sm:$0xff]   ;;  %v2555_v47 = vpack.c.bf16 %v5453_v16, %v5453_v16 }
 0x248   : > { %3470 = vmatprep.subr.bf16.mxu1 %v4500_v48  ;;  %v2557_v48 = vpack.c.bf16 %v5458_v18, %v5458_v18  ;;  %v2687_v16 = vld [vmem:[%s5667_s4] sm:$0x3] }
 0x249   : > { %v2692_v10 = vrot.slane %v2687_v16, %v2437_v33 }
 0x24a   : > { %3430 = vmatpush1.bf16.msra.mxu0 %v4495_v51  ;;  %v4569_v51 = vld [vmem:[%s5668_s5 + $0x70] sm:$0xff]  }
 0x24b   : > { %3471 = vmatpush1.bf16.msra.mxu1 %v4498_v52  ;;  %3431 = vmatprep.subr.bf16.mxu0 %v4503_v53  ;;  %v4570_v52 = vld [vmem:[%s5668_s5 + $0x30] sm:$0xff]   ;;  %v4571_v53 = vld [vmem:[%s5668_s5 + $0x68] sm:$0xff]  }
 0x24c   : > { %3472 = vmatprep.subr.bf16.mxu1 %v4506_v54  ;;  %v4572_v54 = vld [vmem:[%s5668_s5 + $0x28] sm:$0xff]  }
 0x24e   : > { %3432 = vmatpush1.bf16.msra.mxu0 %v4501_v59  ;;  %v4574_v59 = vld [vmem:[%s5668_s5 + $0x20] sm:$0xff]  }
 0x24f   : > { %3473 = vmatpush1.bf16.msra.mxu1 %v4504_v60  ;;  %3433 = vmatprep.subr.bf16.mxu0 %v4509_v1  ;;  %v4575_v60 = vld [vmem:[%s5668_s5 + $0x58] sm:$0xff]  }
 0x250   : > { %3474 = vmatprep.subr.bf16.mxu1 %v4512_v2  ;;  %v4576_v1 = vld [vmem:[%s5668_s5 + $0x18] sm:$0xff]   ;;  %v4577_v2 = vld [vmem:[%s5668_s5 + $0x50] sm:$0xff]  }
 0x252   : > { %3434 = vmatpush1.bf16.msra.mxu0 %v4507_v3  ;;  %v4578_v3 = vld [vmem:[%s5668_s5 + $0x10] sm:$0xff]  }
 0x253   : > { %3475 = vmatpush1.bf16.msra.mxu1 %v4510_v5  ;;  %3435 = vmatprep.subr.bf16.mxu0 %v4515_v8  ;;  %v4579_v5 = vld [vmem:[%s5668_s5 + $0x48] sm:$0xff]   ;;  %v4581_v8 = vld [vmem:[%s5668_s5 + $0x40] sm:$0xff]  }
 0x254   : > { %3476 = vmatprep.subr.bf16.mxu1 %v4518_v11  ;;  %v4582_v11 = vld [vmem:[%s5668_s5] sm:$0xff]  }
 0x256   : > { %3436 = vmatpush1.bf16.msra.mxu0 %v4513_v56  ;;  %v4584_v56 = vld [vmem:[%s5670_s7 + $0x30] sm:$0xff]  }
 0x257   : > { %3477 = vmatpush1.bf16.msra.mxu1 %v4516_v6  ;;  %3437 = vmatprep.subr.bf16.mxu0 %v4521_v9  ;;  %v4585_v6 = vld [vmem:[%s5670_s7 + $0x28] sm:$0xff]   ;;  %v4586_v9 = vld [vmem:[%s5670_s7 + $0x20] sm:$0xff]  }
 0x258   : > { %3478 = vmatprep.subr.bf16.mxu1 %v4524_v15  ;;  %v4587_v15 = vld [vmem:[%s5670_s7 + $0x18] sm:$0xff]  }
 0x25a   : > { %3438 = vmatpush2.bf16.msra.mxu0 %v4519_v19 }
 0x25b   : > { %3479 = vmatpush2.bf16.msra.mxu1 %v4522_v46  ;;  %3439 = vmatprep.subr.bf16.mxu0 %v4527_v21 }
 0x25c   : > { %3480 = vmatprep.subr.bf16.mxu1 %v4530_v22 }
 0x25e   : > { %3440 = vmatpush2.bf16.msra.mxu0 %v4525_v13 }
 0x25f   : > { %3481 = vmatpush2.bf16.msra.mxu1 %v4528_v23  ;;  %3441 = vmatprep.subr.bf16.mxu0 %v4533_v24  ;;  %v2696_v23 = vrot.slane %v2687_v16, %v2441_v35  ;;  %v4589_v35 = vld [vmem:[%s5670_s7 + $0x8] sm:$0xff]  }
 0x260   : > { %3482 = vmatprep.subr.bf16.mxu1 %v4536_v25 }
 0x262   : > { %3442 = vmatpush2.bf16.msra.mxu0 %v4531_v26 }
 0x263   : > { %3483 = vmatpush2.bf16.msra.mxu1 %v4534_v0  ;;  %3443 = vmatprep.subr.bf16.mxu0 %v4539_v62 }
 0x264   : > { %3484 = vmatprep.subr.bf16.mxu1 %v4542_v4 }
 0x266   : > { %3444 = vmatpush2.bf16.msra.mxu0 %v4537_v63 }
 0x267   : > { %3485 = vmatpush2.bf16.msra.mxu1 %v4540_v14  ;;  %3445 = vmatprep.subr.bf16.mxu0 %v4545_v27 }
 0x268   : > { %3486 = vmatprep.subr.bf16.mxu1 %v4548_v28 }
 0x26a   : > { %3446 = vmatpush2.bf16.msra.mxu0 %v4543_v29 }
 0x26b   : > { %3487 = vmatpush2.bf16.msra.mxu1 %v4546_v30  ;;  %3447 = vmatprep.subr.bf16.mxu0 %v4551_v31 }
 0x26c   : > { %3488 = vmatprep.subr.bf16.mxu1 %v4554_v32 }
 0x26e   : > { %3448 = vmatpush2.bf16.msra.mxu0 %v4549_v34 }
 0x26f   : > { %3489 = vmatpush2.bf16.msra.mxu1 %v4552_v36  ;;  %3449 = vmatprep.subr.bf16.mxu0 %v4557_v37 }
 0x270   : > { %3490 = vmatprep.subr.bf16.mxu1 %v4560_v38  ;;  %v4590_v38 = vld [vmem:[%s5670_s7] sm:$0xff]  }
 0x272   : > { %3450 = vmatpush2.bf16.msra.mxu0 %v4555_v40 }
 0x273   : > { %3491 = vmatpush2.bf16.msra.mxu1 %v4558_v39  ;;  %3451 = vmatprep.subr.bf16.mxu0 %v4563_v41  ;;  %v4257_v39 = vld [vmem:[%s5669_s6] ss:$0 sm:$0xff] }
 0x274   : > { %3492 = vmatprep.subr.bf16.mxu1 %v4566_v42 }
 0x276   : > { %3452 = vmatpush2.bf16.msra.mxu0 %v4561_v44 }
 0x277   : > { %3493 = vmatpush2.bf16.msra.mxu1 %v4564_v45  ;;  %4289 = vmatprep.subr.bf16.mxu0 %v4567_v49 }
 0x278   : > { %4320 = vmatprep.subr.bf16.mxu1 %v4645_v55 }
 0x279   : > { %3454 = vmatmul.mubr.bf16.vlgmr.msra.gmra.mxu0 %v2555_v47 }
 0x27a   : > { %3495 = vmatmul.mubr.bf16.vlgmr.msra.gmra.mxu1 %v2557_v48  ;;  %4290 = vmatpush3.bf16.msra.mxu0 %v4568_v50  ;;  %v4274_v50 = vld [vmem:[%s5671_s8] ss:$0 sm:$0xff] }
 0x27b   : > { %4291 = vmatprep.subr.bf16.mxu0 %v4569_v51  ;;  %4321 = vmatpush3.bf16.msra.mxu1 %v4583_v12 }
 0x27c   : > { %4322 = vmatprep.subr.bf16.mxu1 %v4645_v55  ;;  %4336 = vmatprep.mubr.msk.bf16.mxu1 %vm4646_vm2, %v4645_v55 }
 0x27e   : > { %4292 = vmatpush3.bf16.msra.mxu0 %v4570_v52 }
 0x27f   : > { %4293 = vmatprep.subr.bf16.mxu0 %v4571_v53  ;;  %4323 = vmatpush3.bf16.msra.mxu1 %v4584_v56 }
 0x280   : > { %4324 = vmatprep.subr.bf16.mxu1 %v4645_v55 }
 0x282   : > { %4294 = vmatpush3.bf16.msra.mxu0 %v4572_v54 }
 0x283   : > { %4295 = vmatprep.subr.bf16.mxu0 %v4573_v58  ;;  %4325 = vmatpush3.bf16.msra.mxu1 %v4585_v6 }
 0x284   : > { %4326 = vmatprep.subr.bf16.mxu1 %v4645_v55 }
 0x286   : > { %4296 = vmatpush3.bf16.msra.mxu0 %v4574_v59 }
 0x287   : > { %4297 = vmatprep.subr.bf16.mxu0 %v4575_v60  ;;  %4327 = vmatpush3.bf16.msra.mxu1 %v4586_v9 }
 0x288   : > { %4328 = vmatprep.subr.bf16.mxu1 %v4645_v55 }
 0x28a   : > { %4298 = vmatpush3.bf16.msra.mxu0 %v4576_v1 }
 0x28b   : > { %4299 = vmatprep.subr.bf16.mxu0 %v4577_v2  ;;  %4329 = vmatpush3.bf16.msra.mxu1 %v4587_v15 }
 0x28c   : > { %4330 = vmatprep.subr.bf16.mxu1 %v4645_v55 }
 0x28e   : > { %4300 = vmatpush3.bf16.msra.mxu0 %v4578_v3 }
 0x28f   : > { %4301 = vmatprep.subr.bf16.mxu0 %v4579_v5  ;;  %4331 = vmatpush3.bf16.msra.mxu1 %v4588_v17 }
 0x290   : > { %4332 = vmatprep.subr.bf16.mxu1 %v4645_v55 }
 0x292   : > { %4302 = vmatpush3.bf16.msra.mxu0 %v4580_v7 }
 0x293   : > { %4303 = vmatprep.subr.bf16.mxu0 %v4581_v8  ;;  %4333 = vmatpush3.bf16.msra.mxu1 %v4589_v35 }
 0x294   : > { %4334 = vmatprep.subr.bf16.mxu1 %v4645_v55 }
 0x296   : > { %4304 = vmatpush3.bf16.msra.mxu0 %v4582_v11 }
 0x297   : > { %4335 = vmatpush3.bf16.msra.mxu1 %v4590_v38 }
 0x2f9   : > { %v3373_v43 = vpop.f32.mrf.mxu0 }
 0x2fa   : > { %v3414_v18 = vpop.f32.mrf.mxu1  ;;  %v3374_v19 = vadd.f32 %v3373_v43, %v2692_v10 }
 0x2fb   : > { %v3375_v46 = vpop.f32.mrf.mxu0 }
 0x2fc   : > { %v3416_v21 = vpop.f32.mrf.mxu1  ;;  %v3415_v22 = vadd.f32 %v3414_v18, %v3374_v19  ;;  %v3376_v24 = vadd.f32 %v3375_v46, %v2696_v23 }
 0x2fd   : > { %v3377_v57 = vpop.f32.mrf.mxu0 }
 0x2fe   : > { %v3418_v20 = vpop.f32.mrf.mxu1  ;;  %v3417_v0 = vadd.f32 %v3416_v21, %v3376_v24 }
 0x2ff   : > { %v3378_v61 = vpop.f32.mrf.mxu0 }
 0x300   : > { %v3419_v13 = vpop.f32.mrf.mxu1 }
 0x339   : > { %v3455_v25 = vpop.f32.mrf.mxu0 }
 0x33a   : > { %v3496_v26 = vpop.f32.mrf.mxu1  ;;  %v3456_v62 = vadd.f32 %v3455_v25, %v3415_v22 }
 0x33b   : > { %v3457_v4 = vpop.f32.mrf.mxu0 }
 0x33c   : > { %v3498_v33 = vpop.f32.mrf.mxu1  ;;  %v3497_v63 = vadd.f32 %v3496_v26, %v3456_v62  ;;  %v3458_v14 = vadd.f32 %v3457_v4, %v3417_v0 }
 0x33d   : > { %v3459_v27 = vpop.f32.mrf.mxu0 }
 0x33e   : > { %v3500_v28 = vpop.f32.mrf.mxu1  ;;  %v3499_v29 = vadd.f32 %v3498_v33, %v3458_v14  ;;  %v3503_v30 = vmax.f32 %v3497_v63, 0.0 }
 0x33f   : > { %v3460_v31 = vpop.f32.mrf.mxu0 }
 0x340   : > { %v3501_v32 = vpop.f32.mrf.mxu1  ;;  %v3504_v34 = vmax.f32 %v3499_v29, 0.0  ;;  %v3505_v37 = vpack.c.bf16 %v3503_v30, %v3503_v30 }
 0x342   : > { %v3506_v36 = vpack.c.bf16 %v3504_v34, %v3504_v34 }
 0x344   : > { %3674 = vmatprep.mubr.bf16.mxu0 %v3506_v36 }
 0x345   : > { %3675 = vmatmul.mubr.bf16.vlgmr.msra.gmra.mxu0 %v3505_v37 }
 0x405   : > { %v4305_v40 = vpop.f32.mrf.mxu0 }
 0x407   : > { %v4306_v41 = vpop.f32.mrf.mxu0 }
 0x408   : > { %v4307_v42 = vadd.f32 %v4306_v41, %v4305_v40 }
 0x409   : > { %v4308_v44 = vpop.f32.mrf.mxu0 }
 0x40a   : > { %v3677_v45 = vadd.f32 %v4307_v42, %v4257_v39 }
 0x40b   : > { %v4309_v47 = vpop.f32.mrf.mxu0 }
 0x40c   : > { %v3682_v48 = vmax.f32 %v3677_v45, 0.0 }
 0x40e   : > { %v3683_v49 = vpack.c.bf16 %v3682_v48, %v3682_v48 }
 0x410   : > { %4337 = vmatmul.mubr.bf16.vlgmr.msra.gmra.mxu1 %v3683_v49 }
 0x4d0   : > { %v3789_v51 = vpop.f32.mrf.mxu1 }
 0x4d1   : > { %v3790_v52 = vadd.f32 %v4274_v50, %v3789_v51 }
 0x4d2   : > { %v4338_v53 = vpop.f32.mrf.mxu1 }
 0x4d3   : > { %3795 = vst [vmem:[#allocation4] sm:$0x3] %v3790_v52 }
 0x4d4   : > { %v3792_v54 = vpop.f32.mrf.mxu1 }
 0x4d6   : > { %v4339_v58 = vpop.f32.mrf.mxu1 }
 0x4d7 PF: > { %p4344_p11 = scmp.eq.s32.totalorder %s4711_s12, 3  ;;  %s4647_s21 = smov [#allocation4]  }
 0x4d8   : > { %s3803_s22 = sshll.u32 %s4647_s21, 4  ;;  %s3804_s22 = int_to_ptr.vmem [resolvable:$true] %s3803_s22 }
 0x4d9   : > { %s4591_s23 = scalar_lea.vmem %s3804_s22, 32  ;;  %p4598_p1 = scmp.lt.s32.totalorder %s3804_s22, %s3804_s22 }
 0x4da   : > { %p4592_p12 = scmp.ne.s32.totalorder %s3804_s22, %s4591_s23  ;;  %p4599_p2 = scmp.lt.s32.totalorder %s4591_s23, %s4591_s23 }
 0x4dc   : > { %p4593_p13 = pnand %p4592_p12, %p4344_p11  ;;  %p4600_p3 = por %p4599_p2, %p4598_p1 }
 0x4de   : > { %p4594_p0 = pneg %p4593_p13 }
 0x4e0   : > { %p4601_p4 = pnand %p4600_p3, %p4594_p0 }
 0x4e2   : > { %4604 = shalt.err (!%p4601_p4)
}
 0x4e3   : > { %4341 = dma.vmem_to_hbm [thread:$0]  (%p4344_p11), %s3804_s22, 32, %s5672_s9, [#allocation5]  }
 0x4e4   : > { %4628 = dma.done.wait (%p4344_p11), [#allocation5], 32  }
 0x4e5   : > { %4630 = vsyncadd (%p4344_p11), [#allocation5], 4294967264 }
 0x4e6 PF: > { %p17_p5 = scmp.ge.s32.totalorder %s4713_s13, 6   ;;  %s5673_s30 = smov %s4637_s10 }
 0x4e7   : > { %s5674_s10 = smov %s4720_s16  ;;  %s5675_s11 = smov %s4713_s13 }
 0x4e8   :  { %19 = sbr.rel (!%p17_p5) target bundleno = 2 (0x2), region = 137 }
 0x4ed   :  { %3816 = vsyncpa [#allocation5], 1 }
 0x4ee   :  { %3818 = vsyncpa [#allocation5 + $0x1], 1 }

</bundles_post_ra>
